<compile_context>
chip_gen: v6e
topology: v6e:2x2x1
jax: 0.10.0
libtpu: 0.0.40
codegen_flags: <defaults>
</compile_context>

<pallas_src>
import jax
import jax.numpy as jnp
from jax import lax
from jax.experimental import pallas as pl
from jax.experimental.pallas import tpu as pltpu

L_IN = 5
CHANNELS = [16, 64, 32]
KSIZES = [4, 2, 3]
EPS = 1e-5

# lengths through the network: 5 -> 4 -> 5 -> 5
L0_OUT = L_IN + 2 - KSIZES[0] + 1      # 4
L1_OUT = L0_OUT + 2 - KSIZES[1] + 1    # 5
L2_OUT = L1_OUT + 2 - KSIZES[2] + 1    # 5
FLAT = L2_OUT * CHANNELS[2]            # 160
HID = 128


def convnet_kernel(x_ref,
                   w0_ref, s0_ref, b0_ref,
                   w1_ref, s1_ref, b1_ref,
                   w2_ref, s2_ref, b2_ref,
                   fw1_ref, fb1_ref, fw2_ref, fb2_ref,
                   o_ref):
    x = x_ref[...]                                            # (TB, 5)

    # ---- layer 0: Conv1d(1, 16, k=4, pad=1) + BN + ReLU ----
    w0 = w0_ref[...]                                          # (4, 16)
    s0 = s0_ref[...]; b0 = b0_ref[...]                        # (1, 16)
    h0 = []
    for t in range(L0_OUT):
        acc = None
        for k in range(KSIZES[0]):
            p = t - 1 + k                                     # padded position
            if 0 <= p < L_IN:                                 # out-of-range taps hit zeros
                term = x[:, p:p + 1] * w0[k:k + 1, :]         # (TB,1)*(1,16)->(TB,16)
                acc = term if acc is None else acc + term
        h0.append(jnp.maximum(acc * s0 + b0, 0.0))

    # ---- layer 1: Conv1d(16, 64, k=2, pad=1) + BN + ReLU ----
    w1 = w1_ref[...]                                          # (2, 16, 64)
    s1 = s1_ref[...]; b1 = b1_ref[...]
    h1 = []
    for t in range(L1_OUT):
        acc = None
        for k in range(KSIZES[1]):
            p = t - 1 + k
            if 0 <= p < L0_OUT:
                term = jnp.dot(h0[p], w1[k],
                               preferred_element_type=jnp.float32)
                acc = term if acc is None else acc + term
        h1.append(jnp.maximum(acc * s1 + b1, 0.0))

    # ---- layer 2: Conv1d(64, 32, k=3, pad=1) + BN + ReLU ----
    w2 = w2_ref[...]                                          # (3, 64, 32)
    s2 = s2_ref[...]; b2 = b2_ref[...]
    h2 = []
    for t in range(L2_OUT):
        acc = None
        for k in range(KSIZES[2]):
            p = t - 1 + k
            if 0 <= p < L1_OUT:
                term = jnp.dot(h1[p], w2[k],
                               preferred_element_type=jnp.float32)
                acc = term if acc is None else acc + term
        h2.append(jnp.maximum(acc * s2 + b2, 0.0))

    # ---- fc1 + ReLU (torch C-major flatten folded into per-position dots) ----
    z = fb1_ref[...]                                          # (1, 128) -> broadcasts
    for l in range(L2_OUT):
        z = z + jnp.dot(h2[l], fw1_ref[l],                    # (TB,32)x(32,128)
                        preferred_element_type=jnp.float32)
    z = jnp.maximum(z, 0.0)

    # ---- fc2 ----
    y = jnp.dot(z, fw2_ref[...],
                preferred_element_type=jnp.float32) + fb2_ref[...]
    o_ref[...] = y                                            # (TB, 1)


def convnet_forward(x, kparams, max_tb=256):
    (w0, s0, b0, w1, s1, b1, w2, s2, b2, fw1, fb1, fw2, fb2) = kparams
    B = x.shape[0]

    TB = min(max_tb, ((B + 7) // 8) * 8)                      # multiple of 8
    B_pad = ((B + TB - 1) // TB) * TB
    x_p = jnp.pad(x.astype(jnp.float32), ((0, B_pad - B), (0, 0)))

    def full(a):
        nd = a.ndim
        return pl.BlockSpec(a.shape, lambda b, _nd=nd: (0,) * _nd)

    flops_per_sample = 2 * (L0_OUT * KSIZES[0] * CHANNELS[0]
                            + L1_OUT * KSIZES[1] * CHANNELS[0] * CHANNELS[1]
                            + L2_OUT * KSIZES[2] * CHANNELS[1] * CHANNELS[2]
                            + FLAT * HID + HID)
    weight_bytes = sum(int(p.size) * p.dtype.itemsize for p in kparams)
    cost = pl.CostEstimate(flops=flops_per_sample * B_pad,
                           transcendentals=0,
                           bytes_accessed=B_pad * L_IN * 4 + B_pad * 4 + weight_bytes)

    out = pl.pallas_call(
        convnet_kernel,
        out_shape=jax.ShapeDtypeStruct((B_pad, 1), jnp.float32),
        grid_spec=pltpu.PrefetchScalarGridSpec(
            num_scalar_prefetch=0,
            grid=(B_pad // TB,),
            in_specs=[pl.BlockSpec((TB, L_IN), lambda b: (b, 0)),
                      full(w0), full(s0), full(b0),
                      full(w1), full(s1), full(b1),
                      full(w2), full(s2), full(b2),
                      full(fw1), full(fb1), full(fw2), full(fb2)],
            out_specs=pl.BlockSpec((TB, 1), lambda b: (b, 0)),
            scratch_shapes=[]),
        compiler_params=pltpu.CompilerParams(
            dimension_semantics=("parallel",)),
        cost_estimate=cost,
    )(x_p, w0, s0, b0, w1, s1, b1, w2, s2, b2, fw1, fb1, fw2, fb2)
    return out[:B]                                            # (B, 1)


def init_params(key):
    ks = jax.random.split(key, 16)

    def rn(k, shape, scale):
        return (jax.random.normal(k, shape) * scale).astype(jnp.float32)

    # PyTorch-shaped parameters (Conv1d weight: (Cout, Cin, K); Linear: (out, in))
    W0, cb0 = rn(ks[0], (16, 1, 4), 0.3), rn(ks[1], (16,), 0.1)
    W1, cb1 = rn(ks[2], (64, 16, 2), 0.15), rn(ks[3], (64,), 0.1)
    W2, cb2 = rn(ks[4], (32, 64, 3), 0.08), rn(ks[5], (32,), 0.1)
    g0, be0 = 1.0 + rn(ks[6], (16,), 0.1), rn(ks[7], (16,), 0.1)
    g1, be1 = 1.0 + rn(ks[8], (64,), 0.1), rn(ks[9], (64,), 0.1)
    g2, be2 = 1.0 + rn(ks[10], (32,), 0.1), rn(ks[11], (32,), 0.1)
    FW1, FB1 = rn(ks[12], (HID, FLAT), 0.05), rn(ks[13], (HID,), 0.05)
    FW2, FB2 = rn(ks[14], (1, HID), 0.05), rn(ks[15], (1,), 0.05)

    torch_params = {"convs": [(W0, cb0, g0, be0), (W1, cb1, g1, be1), (W2, cb2, g2, be2)],
                    "FW1": FW1, "FB1": FB1, "FW2": FW2, "FB2": FB2}

    def fold_bn(cb, gamma, beta):                     # eval-mode: mean=0, var=1
        scale = gamma / jnp.sqrt(1.0 + EPS)
        bias = cb * scale + beta
        return scale.reshape(1, -1), bias.reshape(1, -1)

    s0, b0 = fold_bn(cb0, g0, be0)
    s1, b1 = fold_bn(cb1, g1, be1)
    s2, b2 = fold_bn(cb2, g2, be2)

    # conv weights (Cout, Cin, K) -> (K, Cin, Cout); layer 0 squeezed to (K, Cout)
    w0k = jnp.transpose(W0, (2, 1, 0))[:, 0, :]                 # (4, 16)
    w1k = jnp.transpose(W1, (2, 1, 0))                          # (2, 16, 64)
    w2k = jnp.transpose(W2, (2, 1, 0))                          # (3, 64, 32)

    # fc1: fold torch's C-major flatten (index c*L + l) into per-position
    # weight slabs: fw1[l, c, :] = FW1[:, c*L + l]  ->  (L2_OUT, 32, HID)
    fw1 = jnp.transpose(FW1.reshape(HID, CHANNELS[2], L2_OUT), (2, 1, 0))
    fb1 = FB1.reshape(1, HID)
    fw2 = FW2.T                                                  # (128, 1)
    fb2 = FB2.reshape(1, 1)

    kernel_params = (w0k, s0, b0, w1k, s1, b1, w2k, s2, b2, fw1, fb1, fw2, fb2)
    return torch_params, kernel_params


def ref_forward(x, tp):
    """Pure-JAX reference with PyTorch NCW semantics (eval-mode BN)."""
    h = x[:, None, :]                                            # (B, 1, 5)
    for (W, cb, g, be) in tp["convs"]:
        h = lax.conv_general_dilated(h, W, window_strides=(1,), padding=[(1, 1)],
                                     dimension_numbers=("NCH", "OIH", "NCH"))
        h = h + cb[None, :, None]
        h = h / jnp.sqrt(1.0 + EPS) * g[None, :, None] + be[None, :, None]
        h = jnp.maximum(h, 0.0)
    flat = h.reshape(h.shape[0], -1)                             # torch C-major flatten
    z = jnp.maximum(flat @ tp["FW1"].T + tp["FB1"], 0.0)
    return z @ tp["FW2"].T + tp["FB2"]


if __name__ == "__main__":
    key = jax.random.PRNGKey(0)
    kp, kx = jax.random.split(key)
    torch_params, kernel_params = init_params(kp)

    B = 4
    x = jax.random.normal(kx, (B, L_IN), dtype=jnp.float32)     # (B, 5) -> unsqueezed inside

    y = convnet_forward(x, kernel_params)
    y = jax.block_until_ready(y)

    y_ref = ref_forward(x, torch_params)
    assert y.shape == (B, 1), y.shape
    if not bool(jnp.allclose(y, y_ref, rtol=1e-3, atol=1e-3)):
        raise AssertionError(f"mismatch: kernel={y} ref={y_ref}")
    print("KERNEL_OK")
</pallas_src>

<mosaic_0001>
module attributes {stable_mosaic.version = 11 : i64} {
  func.func @convnet_kernel(%arg0: i32, %arg1: memref<8x5xf32, #tpu.memory_space<vmem>>, %arg2: memref<4x16xf32, #tpu.memory_space<vmem>>, %arg3: memref<1x16xf32, #tpu.memory_space<vmem>>, %arg4: memref<1x16xf32, #tpu.memory_space<vmem>>, %arg5: memref<2x16x64xf32, #tpu.memory_space<vmem>>, %arg6: memref<1x64xf32, #tpu.memory_space<vmem>>, %arg7: memref<1x64xf32, #tpu.memory_space<vmem>>, %arg8: memref<3x64x32xf32, #tpu.memory_space<vmem>>, %arg9: memref<1x32xf32, #tpu.memory_space<vmem>>, %arg10: memref<1x32xf32, #tpu.memory_space<vmem>>, %arg11: memref<5x32x128xf32, #tpu.memory_space<vmem>>, %arg12: memref<1x128xf32, #tpu.memory_space<vmem>>, %arg13: memref<128x1xf32, #tpu.memory_space<vmem>>, %arg14: memref<1x1xf32, #tpu.memory_space<vmem>>, %arg15: memref<8x1xf32, #tpu.memory_space<vmem>>) attributes {dimension_semantics = [#tpu.dimension_semantics<parallel>], iteration_bounds = array<i64: 1>, scalar_prefetch = 0 : i64, scratch_operands = 0 : i64, tpu.core_type = #tpu.core_type<tc>, window_params = [{transform_indices = @transform_0, window_bounds = array<i64: 8, 5>}, {pipeline_mode = #tpu.pipeline_mode<synchronous>, transform_indices = @transform_1, window_bounds = array<i64: 4, 16>}, {pipeline_mode = #tpu.pipeline_mode<synchronous>, transform_indices = @transform_2, window_bounds = array<i64: 1, 16>}, {pipeline_mode = #tpu.pipeline_mode<synchronous>, transform_indices = @transform_3, window_bounds = array<i64: 1, 16>}, {pipeline_mode = #tpu.pipeline_mode<synchronous>, transform_indices = @transform_4, window_bounds = array<i64: 2, 16, 64>}, {pipeline_mode = #tpu.pipeline_mode<synchronous>, transform_indices = @transform_5, window_bounds = array<i64: 1, 64>}, {pipeline_mode = #tpu.pipeline_mode<synchronous>, transform_indices = @transform_6, window_bounds = array<i64: 1, 64>}, {pipeline_mode = #tpu.pipeline_mode<synchronous>, transform_indices = @transform_7, window_bounds = array<i64: 3, 64, 32>}, {pipeline_mode = #tpu.pipeline_mode<synchronous>, transform_indices = @transform_8, window_bounds = array<i64: 1, 32>}, {pipeline_mode = #tpu.pipeline_mode<synchronous>, transform_indices = @transform_9, window_bounds = array<i64: 1, 32>}, {pipeline_mode = #tpu.pipeline_mode<synchronous>, transform_indices = @transform_10, window_bounds = array<i64: 5, 32, 128>}, {pipeline_mode = #tpu.pipeline_mode<synchronous>, transform_indices = @transform_11, window_bounds = array<i64: 1, 128>}, {pipeline_mode = #tpu.pipeline_mode<synchronous>, transform_indices = @transform_12, window_bounds = array<i64: 128, 1>}, {pipeline_mode = #tpu.pipeline_mode<synchronous>, transform_indices = @transform_13, window_bounds = array<i64: 1, 1>}, {transform_indices = @transform_14, window_bounds = array<i64: 8, 1>}]} {
    %c0 = arith.constant 0 : index
    %c0_0 = arith.constant 0 : index
    %0 = vector.load %arg1[%c0, %c0_0] : memref<8x5xf32, #tpu.memory_space<vmem>>, vector<8x5xf32>
    %c0_1 = arith.constant 0 : index
    %c0_2 = arith.constant 0 : index
    %1 = vector.load %arg2[%c0_1, %c0_2] : memref<4x16xf32, #tpu.memory_space<vmem>>, vector<4x16xf32>
    %c0_3 = arith.constant 0 : index
    %c0_4 = arith.constant 0 : index
    %2 = vector.load %arg3[%c0_3, %c0_4] : memref<1x16xf32, #tpu.memory_space<vmem>>, vector<1x16xf32>
    %c0_5 = arith.constant 0 : index
    %c0_6 = arith.constant 0 : index
    %3 = vector.load %arg4[%c0_5, %c0_6] : memref<1x16xf32, #tpu.memory_space<vmem>>, vector<1x16xf32>
    %4 = vector.extract_strided_slice %0 {offsets = [0, 0], sizes = [8, 1], strides = [1, 1]} : vector<8x5xf32> to vector<8x1xf32>
    %5 = vector.extract_strided_slice %1 {offsets = [1, 0], sizes = [1, 16], strides = [1, 1]} : vector<4x16xf32> to vector<1x16xf32>
    %6 = vector.broadcast %4 : vector<8x1xf32> to vector<8x16xf32>
    %7 = vector.broadcast %5 : vector<1x16xf32> to vector<8x16xf32>
    %8 = arith.mulf %6, %7 : vector<8x16xf32>
    %9 = vector.extract_strided_slice %0 {offsets = [0, 1], sizes = [8, 1], strides = [1, 1]} : vector<8x5xf32> to vector<8x1xf32>
    %10 = vector.extract_strided_slice %1 {offsets = [2, 0], sizes = [1, 16], strides = [1, 1]} : vector<4x16xf32> to vector<1x16xf32>
    %11 = vector.broadcast %9 : vector<8x1xf32> to vector<8x16xf32>
    %12 = vector.broadcast %10 : vector<1x16xf32> to vector<8x16xf32>
    %13 = arith.mulf %11, %12 : vector<8x16xf32>
    %14 = arith.addf %8, %13 : vector<8x16xf32>
    %15 = vector.extract_strided_slice %0 {offsets = [0, 2], sizes = [8, 1], strides = [1, 1]} : vector<8x5xf32> to vector<8x1xf32>
    %16 = vector.extract_strided_slice %1 {offsets = [3, 0], sizes = [1, 16], strides = [1, 1]} : vector<4x16xf32> to vector<1x16xf32>
    %17 = vector.broadcast %15 : vector<8x1xf32> to vector<8x16xf32>
    %18 = vector.broadcast %16 : vector<1x16xf32> to vector<8x16xf32>
    %19 = arith.mulf %17, %18 : vector<8x16xf32>
    %20 = arith.addf %14, %19 : vector<8x16xf32>
    %21 = vector.broadcast %2 : vector<1x16xf32> to vector<8x16xf32>
    %22 = arith.mulf %20, %21 : vector<8x16xf32>
    %23 = vector.broadcast %3 : vector<1x16xf32> to vector<8x16xf32>
    %24 = arith.addf %22, %23 : vector<8x16xf32>
    %cst = arith.constant 0.000000e+00 : f32
    %25 = vector.broadcast %cst : f32 to vector<8x16xf32>
    %26 = arith.maximumf %24, %25 : vector<8x16xf32>
    %27 = vector.extract_strided_slice %0 {offsets = [0, 0], sizes = [8, 1], strides = [1, 1]} : vector<8x5xf32> to vector<8x1xf32>
    %28 = vector.extract_strided_slice %1 {offsets = [0, 0], sizes = [1, 16], strides = [1, 1]} : vector<4x16xf32> to vector<1x16xf32>
    %29 = vector.broadcast %27 : vector<8x1xf32> to vector<8x16xf32>
    %30 = vector.broadcast %28 : vector<1x16xf32> to vector<8x16xf32>
    %31 = arith.mulf %29, %30 : vector<8x16xf32>
    %32 = vector.extract_strided_slice %0 {offsets = [0, 1], sizes = [8, 1], strides = [1, 1]} : vector<8x5xf32> to vector<8x1xf32>
    %33 = vector.extract_strided_slice %1 {offsets = [1, 0], sizes = [1, 16], strides = [1, 1]} : vector<4x16xf32> to vector<1x16xf32>
    %34 = vector.broadcast %32 : vector<8x1xf32> to vector<8x16xf32>
    %35 = vector.broadcast %33 : vector<1x16xf32> to vector<8x16xf32>
    %36 = arith.mulf %34, %35 : vector<8x16xf32>
    %37 = arith.addf %31, %36 : vector<8x16xf32>
    %38 = vector.extract_strided_slice %0 {offsets = [0, 2], sizes = [8, 1], strides = [1, 1]} : vector<8x5xf32> to vector<8x1xf32>
    %39 = vector.extract_strided_slice %1 {offsets = [2, 0], sizes = [1, 16], strides = [1, 1]} : vector<4x16xf32> to vector<1x16xf32>
    %40 = vector.broadcast %38 : vector<8x1xf32> to vector<8x16xf32>
    %41 = vector.broadcast %39 : vector<1x16xf32> to vector<8x16xf32>
    %42 = arith.mulf %40, %41 : vector<8x16xf32>
    %43 = arith.addf %37, %42 : vector<8x16xf32>
    %44 = vector.extract_strided_slice %0 {offsets = [0, 3], sizes = [8, 1], strides = [1, 1]} : vector<8x5xf32> to vector<8x1xf32>
    %45 = vector.extract_strided_slice %1 {offsets = [3, 0], sizes = [1, 16], strides = [1, 1]} : vector<4x16xf32> to vector<1x16xf32>
    %46 = vector.broadcast %44 : vector<8x1xf32> to vector<8x16xf32>
    %47 = vector.broadcast %45 : vector<1x16xf32> to vector<8x16xf32>
    %48 = arith.mulf %46, %47 : vector<8x16xf32>
    %49 = arith.addf %43, %48 : vector<8x16xf32>
    %50 = vector.broadcast %2 : vector<1x16xf32> to vector<8x16xf32>
    %51 = arith.mulf %49, %50 : vector<8x16xf32>
    %52 = vector.broadcast %3 : vector<1x16xf32> to vector<8x16xf32>
    %53 = arith.addf %51, %52 : vector<8x16xf32>
    %cst_7 = arith.constant 0.000000e+00 : f32
    %54 = vector.broadcast %cst_7 : f32 to vector<8x16xf32>
    %55 = arith.maximumf %53, %54 : vector<8x16xf32>
    %56 = vector.extract_strided_slice %0 {offsets = [0, 1], sizes = [8, 1], strides = [1, 1]} : vector<8x5xf32> to vector<8x1xf32>
    %57 = vector.extract_strided_slice %1 {offsets = [0, 0], sizes = [1, 16], strides = [1, 1]} : vector<4x16xf32> to vector<1x16xf32>
    %58 = vector.broadcast %56 : vector<8x1xf32> to vector<8x16xf32>
    %59 = vector.broadcast %57 : vector<1x16xf32> to vector<8x16xf32>
    %60 = arith.mulf %58, %59 : vector<8x16xf32>
    %61 = vector.extract_strided_slice %0 {offsets = [0, 2], sizes = [8, 1], strides = [1, 1]} : vector<8x5xf32> to vector<8x1xf32>
    %62 = vector.extract_strided_slice %1 {offsets = [1, 0], sizes = [1, 16], strides = [1, 1]} : vector<4x16xf32> to vector<1x16xf32>
    %63 = vector.broadcast %61 : vector<8x1xf32> to vector<8x16xf32>
    %64 = vector.broadcast %62 : vector<1x16xf32> to vector<8x16xf32>
    %65 = arith.mulf %63, %64 : vector<8x16xf32>
    %66 = arith.addf %60, %65 : vector<8x16xf32>
    %67 = vector.extract_strided_slice %0 {offsets = [0, 3], sizes = [8, 1], strides = [1, 1]} : vector<8x5xf32> to vector<8x1xf32>
    %68 = vector.extract_strided_slice %1 {offsets = [2, 0], sizes = [1, 16], strides = [1, 1]} : vector<4x16xf32> to vector<1x16xf32>
    %69 = vector.broadcast %67 : vector<8x1xf32> to vector<8x16xf32>
    %70 = vector.broadcast %68 : vector<1x16xf32> to vector<8x16xf32>
    %71 = arith.mulf %69, %70 : vector<8x16xf32>
    %72 = arith.addf %66, %71 : vector<8x16xf32>
    %73 = vector.extract_strided_slice %0 {offsets = [0, 4], sizes = [8, 1], strides = [1, 1]} : vector<8x5xf32> to vector<8x1xf32>
    %74 = vector.extract_strided_slice %1 {offsets = [3, 0], sizes = [1, 16], strides = [1, 1]} : vector<4x16xf32> to vector<1x16xf32>
    %75 = vector.broadcast %73 : vector<8x1xf32> to vector<8x16xf32>
    %76 = vector.broadcast %74 : vector<1x16xf32> to vector<8x16xf32>
    %77 = arith.mulf %75, %76 : vector<8x16xf32>
    %78 = arith.addf %72, %77 : vector<8x16xf32>
    %79 = vector.broadcast %2 : vector<1x16xf32> to vector<8x16xf32>
    %80 = arith.mulf %78, %79 : vector<8x16xf32>
    %81 = vector.broadcast %3 : vector<1x16xf32> to vector<8x16xf32>
    %82 = arith.addf %80, %81 : vector<8x16xf32>
    %cst_8 = arith.constant 0.000000e+00 : f32
    %83 = vector.broadcast %cst_8 : f32 to vector<8x16xf32>
    %84 = arith.maximumf %82, %83 : vector<8x16xf32>
    %85 = vector.extract_strided_slice %0 {offsets = [0, 2], sizes = [8, 1], strides = [1, 1]} : vector<8x5xf32> to vector<8x1xf32>
    %86 = vector.extract_strided_slice %1 {offsets = [0, 0], sizes = [1, 16], strides = [1, 1]} : vector<4x16xf32> to vector<1x16xf32>
    %87 = vector.broadcast %85 : vector<8x1xf32> to vector<8x16xf32>
    %88 = vector.broadcast %86 : vector<1x16xf32> to vector<8x16xf32>
    %89 = arith.mulf %87, %88 : vector<8x16xf32>
    %90 = vector.extract_strided_slice %0 {offsets = [0, 3], sizes = [8, 1], strides = [1, 1]} : vector<8x5xf32> to vector<8x1xf32>
    %91 = vector.extract_strided_slice %1 {offsets = [1, 0], sizes = [1, 16], strides = [1, 1]} : vector<4x16xf32> to vector<1x16xf32>
    %92 = vector.broadcast %90 : vector<8x1xf32> to vector<8x16xf32>
    %93 = vector.broadcast %91 : vector<1x16xf32> to vector<8x16xf32>
    %94 = arith.mulf %92, %93 : vector<8x16xf32>
    %95 = arith.addf %89, %94 : vector<8x16xf32>
    %96 = vector.extract_strided_slice %0 {offsets = [0, 4], sizes = [8, 1], strides = [1, 1]} : vector<8x5xf32> to vector<8x1xf32>
    %97 = vector.extract_strided_slice %1 {offsets = [2, 0], sizes = [1, 16], strides = [1, 1]} : vector<4x16xf32> to vector<1x16xf32>
    %98 = vector.broadcast %96 : vector<8x1xf32> to vector<8x16xf32>
    %99 = vector.broadcast %97 : vector<1x16xf32> to vector<8x16xf32>
    %100 = arith.mulf %98, %99 : vector<8x16xf32>
    %101 = arith.addf %95, %100 : vector<8x16xf32>
    %102 = vector.broadcast %2 : vector<1x16xf32> to vector<8x16xf32>
    %103 = arith.mulf %101, %102 : vector<8x16xf32>
    %104 = vector.broadcast %3 : vector<1x16xf32> to vector<8x16xf32>
    %105 = arith.addf %103, %104 : vector<8x16xf32>
    %cst_9 = arith.constant 0.000000e+00 : f32
    %106 = vector.broadcast %cst_9 : f32 to vector<8x16xf32>
    %107 = arith.maximumf %105, %106 : vector<8x16xf32>
    %c0_10 = arith.constant 0 : index
    %c0_11 = arith.constant 0 : index
    %c0_12 = arith.constant 0 : index
    %108 = vector.load %arg5[%c0_10, %c0_11, %c0_12] : memref<2x16x64xf32, #tpu.memory_space<vmem>>, vector<2x16x64xf32>
    %c0_13 = arith.constant 0 : index
    %c0_14 = arith.constant 0 : index
    %109 = vector.load %arg6[%c0_13, %c0_14] : memref<1x64xf32, #tpu.memory_space<vmem>>, vector<1x64xf32>
    %c0_15 = arith.constant 0 : index
    %c0_16 = arith.constant 0 : index
    %110 = vector.load %arg7[%c0_15, %c0_16] : memref<1x64xf32, #tpu.memory_space<vmem>>, vector<1x64xf32>
    %111 = vector.extract_strided_slice %108 {offsets = [1, 0, 0], sizes = [1, 16, 64], strides = [1, 1, 1]} : vector<2x16x64xf32> to vector<1x16x64xf32>
    %112 = vector.shape_cast %111 : vector<1x16x64xf32> to vector<16x64xf32>
    %cst_17 = arith.constant dense<0.000000e+00> : vector<8x64xf32>
    %113 = tpu.matmul %26, %112, %cst_17 {dimension_numbers = #tpu.dot_dimension_numbers<[1], [0], [0], [1], [0, 0, 1, 1], [], []>} : vector<8x16xf32>, vector<16x64xf32>, vector<8x64xf32> -> vector<8x64xf32>
    %114 = vector.broadcast %109 : vector<1x64xf32> to vector<8x64xf32>
    %115 = arith.mulf %113, %114 : vector<8x64xf32>
    %116 = vector.broadcast %110 : vector<1x64xf32> to vector<8x64xf32>
    %117 = arith.addf %115, %116 : vector<8x64xf32>
    %cst_18 = arith.constant 0.000000e+00 : f32
    %118 = vector.broadcast %cst_18 : f32 to vector<8x64xf32>
    %119 = arith.maximumf %117, %118 : vector<8x64xf32>
    %120 = vector.extract_strided_slice %108 {offsets = [0, 0, 0], sizes = [1, 16, 64], strides = [1, 1, 1]} : vector<2x16x64xf32> to vector<1x16x64xf32>
    %121 = vector.shape_cast %120 : vector<1x16x64xf32> to vector<16x64xf32>
    %cst_19 = arith.constant dense<0.000000e+00> : vector<8x64xf32>
    %122 = tpu.matmul %26, %121, %cst_19 {dimension_numbers = #tpu.dot_dimension_numbers<[1], [0], [0], [1], [0, 0, 1, 1], [], []>} : vector<8x16xf32>, vector<16x64xf32>, vector<8x64xf32> -> vector<8x64xf32>
    %123 = vector.extract_strided_slice %108 {offsets = [1, 0, 0], sizes = [1, 16, 64], strides = [1, 1, 1]} : vector<2x16x64xf32> to vector<1x16x64xf32>
    %124 = vector.shape_cast %123 : vector<1x16x64xf32> to vector<16x64xf32>
    %cst_20 = arith.constant dense<0.000000e+00> : vector<8x64xf32>
    %125 = tpu.matmul %55, %124, %cst_20 {dimension_numbers = #tpu.dot_dimension_numbers<[1], [0], [0], [1], [0, 0, 1, 1], [], []>} : vector<8x16xf32>, vector<16x64xf32>, vector<8x64xf32> -> vector<8x64xf32>
    %126 = arith.addf %122, %125 : vector<8x64xf32>
    %127 = vector.broadcast %109 : vector<1x64xf32> to vector<8x64xf32>
    %128 = arith.mulf %126, %127 : vector<8x64xf32>
    %129 = vector.broadcast %110 : vector<1x64xf32> to vector<8x64xf32>
    %130 = arith.addf %128, %129 : vector<8x64xf32>
    %cst_21 = arith.constant 0.000000e+00 : f32
    %131 = vector.broadcast %cst_21 : f32 to vector<8x64xf32>
    %132 = arith.maximumf %130, %131 : vector<8x64xf32>
    %133 = vector.extract_strided_slice %108 {offsets = [0, 0, 0], sizes = [1, 16, 64], strides = [1, 1, 1]} : vector<2x16x64xf32> to vector<1x16x64xf32>
    %134 = vector.shape_cast %133 : vector<1x16x64xf32> to vector<16x64xf32>
    %cst_22 = arith.constant dense<0.000000e+00> : vector<8x64xf32>
    %135 = tpu.matmul %55, %134, %cst_22 {dimension_numbers = #tpu.dot_dimension_numbers<[1], [0], [0], [1], [0, 0, 1, 1], [], []>} : vector<8x16xf32>, vector<16x64xf32>, vector<8x64xf32> -> vector<8x64xf32>
    %136 = vector.extract_strided_slice %108 {offsets = [1, 0, 0], sizes = [1, 16, 64], strides = [1, 1, 1]} : vector<2x16x64xf32> to vector<1x16x64xf32>
    %137 = vector.shape_cast %136 : vector<1x16x64xf32> to vector<16x64xf32>
    %cst_23 = arith.constant dense<0.000000e+00> : vector<8x64xf32>
    %138 = tpu.matmul %84, %137, %cst_23 {dimension_numbers = #tpu.dot_dimension_numbers<[1], [0], [0], [1], [0, 0, 1, 1], [], []>} : vector<8x16xf32>, vector<16x64xf32>, vector<8x64xf32> -> vector<8x64xf32>
    %139 = arith.addf %135, %138 : vector<8x64xf32>
    %140 = vector.broadcast %109 : vector<1x64xf32> to vector<8x64xf32>
    %141 = arith.mulf %139, %140 : vector<8x64xf32>
    %142 = vector.broadcast %110 : vector<1x64xf32> to vector<8x64xf32>
    %143 = arith.addf %141, %142 : vector<8x64xf32>
    %cst_24 = arith.constant 0.000000e+00 : f32
    %144 = vector.broadcast %cst_24 : f32 to vector<8x64xf32>
    %145 = arith.maximumf %143, %144 : vector<8x64xf32>
    %146 = vector.extract_strided_slice %108 {offsets = [0, 0, 0], sizes = [1, 16, 64], strides = [1, 1, 1]} : vector<2x16x64xf32> to vector<1x16x64xf32>
    %147 = vector.shape_cast %146 : vector<1x16x64xf32> to vector<16x64xf32>
    %cst_25 = arith.constant dense<0.000000e+00> : vector<8x64xf32>
    %148 = tpu.matmul %84, %147, %cst_25 {dimension_numbers = #tpu.dot_dimension_numbers<[1], [0], [0], [1], [0, 0, 1, 1], [], []>} : vector<8x16xf32>, vector<16x64xf32>, vector<8x64xf32> -> vector<8x64xf32>
    %149 = vector.extract_strided_slice %108 {offsets = [1, 0, 0], sizes = [1, 16, 64], strides = [1, 1, 1]} : vector<2x16x64xf32> to vector<1x16x64xf32>
    %150 = vector.shape_cast %149 : vector<1x16x64xf32> to vector<16x64xf32>
    %cst_26 = arith.constant dense<0.000000e+00> : vector<8x64xf32>
    %151 = tpu.matmul %107, %150, %cst_26 {dimension_numbers = #tpu.dot_dimension_numbers<[1], [0], [0], [1], [0, 0, 1, 1], [], []>} : vector<8x16xf32>, vector<16x64xf32>, vector<8x64xf32> -> vector<8x64xf32>
    %152 = arith.addf %148, %151 : vector<8x64xf32>
    %153 = vector.broadcast %109 : vector<1x64xf32> to vector<8x64xf32>
    %154 = arith.mulf %152, %153 : vector<8x64xf32>
    %155 = vector.broadcast %110 : vector<1x64xf32> to vector<8x64xf32>
    %156 = arith.addf %154, %155 : vector<8x64xf32>
    %cst_27 = arith.constant 0.000000e+00 : f32
    %157 = vector.broadcast %cst_27 : f32 to vector<8x64xf32>
    %158 = arith.maximumf %156, %157 : vector<8x64xf32>
    %159 = vector.extract_strided_slice %108 {offsets = [0, 0, 0], sizes = [1, 16, 64], strides = [1, 1, 1]} : vector<2x16x64xf32> to vector<1x16x64xf32>
    %160 = vector.shape_cast %159 : vector<1x16x64xf32> to vector<16x64xf32>
    %cst_28 = arith.constant dense<0.000000e+00> : vector<8x64xf32>
    %161 = tpu.matmul %107, %160, %cst_28 {dimension_numbers = #tpu.dot_dimension_numbers<[1], [0], [0], [1], [0, 0, 1, 1], [], []>} : vector<8x16xf32>, vector<16x64xf32>, vector<8x64xf32> -> vector<8x64xf32>
    %162 = vector.broadcast %109 : vector<1x64xf32> to vector<8x64xf32>
    %163 = arith.mulf %161, %162 : vector<8x64xf32>
    %164 = vector.broadcast %110 : vector<1x64xf32> to vector<8x64xf32>
    %165 = arith.addf %163, %164 : vector<8x64xf32>
    %cst_29 = arith.constant 0.000000e+00 : f32
    %166 = vector.broadcast %cst_29 : f32 to vector<8x64xf32>
    %167 = arith.maximumf %165, %166 : vector<8x64xf32>
    %c0_30 = arith.constant 0 : index
    %c0_31 = arith.constant 0 : index
    %c0_32 = arith.constant 0 : index
    %168 = vector.load %arg8[%c0_30, %c0_31, %c0_32] : memref<3x64x32xf32, #tpu.memory_space<vmem>>, vector<3x64x32xf32>
    %c0_33 = arith.constant 0 : index
    %c0_34 = arith.constant 0 : index
    %169 = vector.load %arg9[%c0_33, %c0_34] : memref<1x32xf32, #tpu.memory_space<vmem>>, vector<1x32xf32>
    %c0_35 = arith.constant 0 : index
    %c0_36 = arith.constant 0 : index
    %170 = vector.load %arg10[%c0_35, %c0_36] : memref<1x32xf32, #tpu.memory_space<vmem>>, vector<1x32xf32>
    %171 = vector.extract_strided_slice %168 {offsets = [1, 0, 0], sizes = [1, 64, 32], strides = [1, 1, 1]} : vector<3x64x32xf32> to vector<1x64x32xf32>
    %172 = vector.shape_cast %171 : vector<1x64x32xf32> to vector<64x32xf32>
    %cst_37 = arith.constant dense<0.000000e+00> : vector<8x32xf32>
    %173 = tpu.matmul %119, %172, %cst_37 {dimension_numbers = #tpu.dot_dimension_numbers<[1], [0], [0], [1], [0, 0, 1, 1], [], []>} : vector<8x64xf32>, vector<64x32xf32>, vector<8x32xf32> -> vector<8x32xf32>
    %174 = vector.extract_strided_slice %168 {offsets = [2, 0, 0], sizes = [1, 64, 32], strides = [1, 1, 1]} : vector<3x64x32xf32> to vector<1x64x32xf32>
    %175 = vector.shape_cast %174 : vector<1x64x32xf32> to vector<64x32xf32>
    %cst_38 = arith.constant dense<0.000000e+00> : vector<8x32xf32>
    %176 = tpu.matmul %132, %175, %cst_38 {dimension_numbers = #tpu.dot_dimension_numbers<[1], [0], [0], [1], [0, 0, 1, 1], [], []>} : vector<8x64xf32>, vector<64x32xf32>, vector<8x32xf32> -> vector<8x32xf32>
    %177 = arith.addf %173, %176 : vector<8x32xf32>
    %178 = vector.broadcast %169 : vector<1x32xf32> to vector<8x32xf32>
    %179 = arith.mulf %177, %178 : vector<8x32xf32>
    %180 = vector.broadcast %170 : vector<1x32xf32> to vector<8x32xf32>
    %181 = arith.addf %179, %180 : vector<8x32xf32>
    %cst_39 = arith.constant 0.000000e+00 : f32
    %182 = vector.broadcast %cst_39 : f32 to vector<8x32xf32>
    %183 = arith.maximumf %181, %182 : vector<8x32xf32>
    %184 = vector.extract_strided_slice %168 {offsets = [0, 0, 0], sizes = [1, 64, 32], strides = [1, 1, 1]} : vector<3x64x32xf32> to vector<1x64x32xf32>
    %185 = vector.shape_cast %184 : vector<1x64x32xf32> to vector<64x32xf32>
    %cst_40 = arith.constant dense<0.000000e+00> : vector<8x32xf32>
    %186 = tpu.matmul %119, %185, %cst_40 {dimension_numbers = #tpu.dot_dimension_numbers<[1], [0], [0], [1], [0, 0, 1, 1], [], []>} : vector<8x64xf32>, vector<64x32xf32>, vector<8x32xf32> -> vector<8x32xf32>
    %187 = vector.extract_strided_slice %168 {offsets = [1, 0, 0], sizes = [1, 64, 32], strides = [1, 1, 1]} : vector<3x64x32xf32> to vector<1x64x32xf32>
    %188 = vector.shape_cast %187 : vector<1x64x32xf32> to vector<64x32xf32>
    %cst_41 = arith.constant dense<0.000000e+00> : vector<8x32xf32>
    %189 = tpu.matmul %132, %188, %cst_41 {dimension_numbers = #tpu.dot_dimension_numbers<[1], [0], [0], [1], [0, 0, 1, 1], [], []>} : vector<8x64xf32>, vector<64x32xf32>, vector<8x32xf32> -> vector<8x32xf32>
    %190 = arith.addf %186, %189 : vector<8x32xf32>
    %191 = vector.extract_strided_slice %168 {offsets = [2, 0, 0], sizes = [1, 64, 32], strides = [1, 1, 1]} : vector<3x64x32xf32> to vector<1x64x32xf32>
    %192 = vector.shape_cast %191 : vector<1x64x32xf32> to vector<64x32xf32>
    %cst_42 = arith.constant dense<0.000000e+00> : vector<8x32xf32>
    %193 = tpu.matmul %145, %192, %cst_42 {dimension_numbers = #tpu.dot_dimension_numbers<[1], [0], [0], [1], [0, 0, 1, 1], [], []>} : vector<8x64xf32>, vector<64x32xf32>, vector<8x32xf32> -> vector<8x32xf32>
    %194 = arith.addf %190, %193 : vector<8x32xf32>
    %195 = vector.broadcast %169 : vector<1x32xf32> to vector<8x32xf32>
    %196 = arith.mulf %194, %195 : vector<8x32xf32>
    %197 = vector.broadcast %170 : vector<1x32xf32> to vector<8x32xf32>
    %198 = arith.addf %196, %197 : vector<8x32xf32>
    %cst_43 = arith.constant 0.000000e+00 : f32
    %199 = vector.broadcast %cst_43 : f32 to vector<8x32xf32>
    %200 = arith.maximumf %198, %199 : vector<8x32xf32>
    %201 = vector.extract_strided_slice %168 {offsets = [0, 0, 0], sizes = [1, 64, 32], strides = [1, 1, 1]} : vector<3x64x32xf32> to vector<1x64x32xf32>
    %202 = vector.shape_cast %201 : vector<1x64x32xf32> to vector<64x32xf32>
    %cst_44 = arith.constant dense<0.000000e+00> : vector<8x32xf32>
    %203 = tpu.matmul %132, %202, %cst_44 {dimension_numbers = #tpu.dot_dimension_numbers<[1], [0], [0], [1], [0, 0, 1, 1], [], []>} : vector<8x64xf32>, vector<64x32xf32>, vector<8x32xf32> -> vector<8x32xf32>
    %204 = vector.extract_strided_slice %168 {offsets = [1, 0, 0], sizes = [1, 64, 32], strides = [1, 1, 1]} : vector<3x64x32xf32> to vector<1x64x32xf32>
    %205 = vector.shape_cast %204 : vector<1x64x32xf32> to vector<64x32xf32>
    %cst_45 = arith.constant dense<0.000000e+00> : vector<8x32xf32>
    %206 = tpu.matmul %145, %205, %cst_45 {dimension_numbers = #tpu.dot_dimension_numbers<[1], [0], [0], [1], [0, 0, 1, 1], [], []>} : vector<8x64xf32>, vector<64x32xf32>, vector<8x32xf32> -> vector<8x32xf32>
    %207 = arith.addf %203, %206 : vector<8x32xf32>
    %208 = vector.extract_strided_slice %168 {offsets = [2, 0, 0], sizes = [1, 64, 32], strides = [1, 1, 1]} : vector<3x64x32xf32> to vector<1x64x32xf32>
    %209 = vector.shape_cast %208 : vector<1x64x32xf32> to vector<64x32xf32>
    %cst_46 = arith.constant dense<0.000000e+00> : vector<8x32xf32>
    %210 = tpu.matmul %158, %209, %cst_46 {dimension_numbers = #tpu.dot_dimension_numbers<[1], [0], [0], [1], [0, 0, 1, 1], [], []>} : vector<8x64xf32>, vector<64x32xf32>, vector<8x32xf32> -> vector<8x32xf32>
    %211 = arith.addf %207, %210 : vector<8x32xf32>
    %212 = vector.broadcast %169 : vector<1x32xf32> to vector<8x32xf32>
    %213 = arith.mulf %211, %212 : vector<8x32xf32>
    %214 = vector.broadcast %170 : vector<1x32xf32> to vector<8x32xf32>
    %215 = arith.addf %213, %214 : vector<8x32xf32>
    %cst_47 = arith.constant 0.000000e+00 : f32
    %216 = vector.broadcast %cst_47 : f32 to vector<8x32xf32>
    %217 = arith.maximumf %215, %216 : vector<8x32xf32>
    %218 = vector.extract_strided_slice %168 {offsets = [0, 0, 0], sizes = [1, 64, 32], strides = [1, 1, 1]} : vector<3x64x32xf32> to vector<1x64x32xf32>
    %219 = vector.shape_cast %218 : vector<1x64x32xf32> to vector<64x32xf32>
    %cst_48 = arith.constant dense<0.000000e+00> : vector<8x32xf32>
    %220 = tpu.matmul %145, %219, %cst_48 {dimension_numbers = #tpu.dot_dimension_numbers<[1], [0], [0], [1], [0, 0, 1, 1], [], []>} : vector<8x64xf32>, vector<64x32xf32>, vector<8x32xf32> -> vector<8x32xf32>
    %221 = vector.extract_strided_slice %168 {offsets = [1, 0, 0], sizes = [1, 64, 32], strides = [1, 1, 1]} : vector<3x64x32xf32> to vector<1x64x32xf32>
    %222 = vector.shape_cast %221 : vector<1x64x32xf32> to vector<64x32xf32>
    %cst_49 = arith.constant dense<0.000000e+00> : vector<8x32xf32>
    %223 = tpu.matmul %158, %222, %cst_49 {dimension_numbers = #tpu.dot_dimension_numbers<[1], [0], [0], [1], [0, 0, 1, 1], [], []>} : vector<8x64xf32>, vector<64x32xf32>, vector<8x32xf32> -> vector<8x32xf32>
    %224 = arith.addf %220, %223 : vector<8x32xf32>
    %225 = vector.extract_strided_slice %168 {offsets = [2, 0, 0], sizes = [1, 64, 32], strides = [1, 1, 1]} : vector<3x64x32xf32> to vector<1x64x32xf32>
    %226 = vector.shape_cast %225 : vector<1x64x32xf32> to vector<64x32xf32>
    %cst_50 = arith.constant dense<0.000000e+00> : vector<8x32xf32>
    %227 = tpu.matmul %167, %226, %cst_50 {dimension_numbers = #tpu.dot_dimension_numbers<[1], [0], [0], [1], [0, 0, 1, 1], [], []>} : vector<8x64xf32>, vector<64x32xf32>, vector<8x32xf32> -> vector<8x32xf32>
    %228 = arith.addf %224, %227 : vector<8x32xf32>
    %229 = vector.broadcast %169 : vector<1x32xf32> to vector<8x32xf32>
    %230 = arith.mulf %228, %229 : vector<8x32xf32>
    %231 = vector.broadcast %170 : vector<1x32xf32> to vector<8x32xf32>
    %232 = arith.addf %230, %231 : vector<8x32xf32>
    %cst_51 = arith.constant 0.000000e+00 : f32
    %233 = vector.broadcast %cst_51 : f32 to vector<8x32xf32>
    %234 = arith.maximumf %232, %233 : vector<8x32xf32>
    %235 = vector.extract_strided_slice %168 {offsets = [0, 0, 0], sizes = [1, 64, 32], strides = [1, 1, 1]} : vector<3x64x32xf32> to vector<1x64x32xf32>
    %236 = vector.shape_cast %235 : vector<1x64x32xf32> to vector<64x32xf32>
    %cst_52 = arith.constant dense<0.000000e+00> : vector<8x32xf32>
    %237 = tpu.matmul %158, %236, %cst_52 {dimension_numbers = #tpu.dot_dimension_numbers<[1], [0], [0], [1], [0, 0, 1, 1], [], []>} : vector<8x64xf32>, vector<64x32xf32>, vector<8x32xf32> -> vector<8x32xf32>
    %238 = vector.extract_strided_slice %168 {offsets = [1, 0, 0], sizes = [1, 64, 32], strides = [1, 1, 1]} : vector<3x64x32xf32> to vector<1x64x32xf32>
    %239 = vector.shape_cast %238 : vector<1x64x32xf32> to vector<64x32xf32>
    %cst_53 = arith.constant dense<0.000000e+00> : vector<8x32xf32>
    %240 = tpu.matmul %167, %239, %cst_53 {dimension_numbers = #tpu.dot_dimension_numbers<[1], [0], [0], [1], [0, 0, 1, 1], [], []>} : vector<8x64xf32>, vector<64x32xf32>, vector<8x32xf32> -> vector<8x32xf32>
    %241 = arith.addf %237, %240 : vector<8x32xf32>
    %242 = vector.broadcast %169 : vector<1x32xf32> to vector<8x32xf32>
    %243 = arith.mulf %241, %242 : vector<8x32xf32>
    %244 = vector.broadcast %170 : vector<1x32xf32> to vector<8x32xf32>
    %245 = arith.addf %243, %244 : vector<8x32xf32>
    %cst_54 = arith.constant 0.000000e+00 : f32
    %246 = vector.broadcast %cst_54 : f32 to vector<8x32xf32>
    %247 = arith.maximumf %245, %246 : vector<8x32xf32>
    %c0_55 = arith.constant 0 : index
    %c0_56 = arith.constant 0 : index
    %248 = vector.load %arg12[%c0_55, %c0_56] : memref<1x128xf32, #tpu.memory_space<vmem>>, vector<1x128xf32>
    %c0_57 = arith.constant 0 : index
    %c0_58 = arith.constant 0 : index
    %c0_59 = arith.constant 0 : index
    %249 = vector.load %arg11[%c0_57, %c0_58, %c0_59] : memref<5x32x128xf32, #tpu.memory_space<vmem>>, vector<1x32x128xf32>
    %250 = vector.shape_cast %249 : vector<1x32x128xf32> to vector<32x128xf32>
    %cst_60 = arith.constant dense<0.000000e+00> : vector<8x128xf32>
    %251 = tpu.matmul %183, %250, %cst_60 {dimension_numbers = #tpu.dot_dimension_numbers<[1], [0], [0], [1], [0, 0, 1, 1], [], []>} : vector<8x32xf32>, vector<32x128xf32>, vector<8x128xf32> -> vector<8x128xf32>
    %252 = vector.broadcast %248 : vector<1x128xf32> to vector<8x128xf32>
    %253 = arith.addf %252, %251 : vector<8x128xf32>
    %c1 = arith.constant 1 : index
    %c0_61 = arith.constant 0 : index
    %c0_62 = arith.constant 0 : index
    %254 = vector.load %arg11[%c1, %c0_61, %c0_62] : memref<5x32x128xf32, #tpu.memory_space<vmem>>, vector<1x32x128xf32>
    %255 = vector.shape_cast %254 : vector<1x32x128xf32> to vector<32x128xf32>
    %cst_63 = arith.constant dense<0.000000e+00> : vector<8x128xf32>
    %256 = tpu.matmul %200, %255, %cst_63 {dimension_numbers = #tpu.dot_dimension_numbers<[1], [0], [0], [1], [0, 0, 1, 1], [], []>} : vector<8x32xf32>, vector<32x128xf32>, vector<8x128xf32> -> vector<8x128xf32>
    %257 = arith.addf %253, %256 : vector<8x128xf32>
    %c2 = arith.constant 2 : index
    %c0_64 = arith.constant 0 : index
    %c0_65 = arith.constant 0 : index
    %258 = vector.load %arg11[%c2, %c0_64, %c0_65] : memref<5x32x128xf32, #tpu.memory_space<vmem>>, vector<1x32x128xf32>
    %259 = vector.shape_cast %258 : vector<1x32x128xf32> to vector<32x128xf32>
    %cst_66 = arith.constant dense<0.000000e+00> : vector<8x128xf32>
    %260 = tpu.matmul %217, %259, %cst_66 {dimension_numbers = #tpu.dot_dimension_numbers<[1], [0], [0], [1], [0, 0, 1, 1], [], []>} : vector<8x32xf32>, vector<32x128xf32>, vector<8x128xf32> -> vector<8x128xf32>
    %261 = arith.addf %257, %260 : vector<8x128xf32>
    %c3 = arith.constant 3 : index
    %c0_67 = arith.constant 0 : index
    %c0_68 = arith.constant 0 : index
    %262 = vector.load %arg11[%c3, %c0_67, %c0_68] : memref<5x32x128xf32, #tpu.memory_space<vmem>>, vector<1x32x128xf32>
    %263 = vector.shape_cast %262 : vector<1x32x128xf32> to vector<32x128xf32>
    %cst_69 = arith.constant dense<0.000000e+00> : vector<8x128xf32>
    %264 = tpu.matmul %234, %263, %cst_69 {dimension_numbers = #tpu.dot_dimension_numbers<[1], [0], [0], [1], [0, 0, 1, 1], [], []>} : vector<8x32xf32>, vector<32x128xf32>, vector<8x128xf32> -> vector<8x128xf32>
    %265 = arith.addf %261, %264 : vector<8x128xf32>
    %c4 = arith.constant 4 : index
    %c0_70 = arith.constant 0 : index
    %c0_71 = arith.constant 0 : index
    %266 = vector.load %arg11[%c4, %c0_70, %c0_71] : memref<5x32x128xf32, #tpu.memory_space<vmem>>, vector<1x32x128xf32>
    %267 = vector.shape_cast %266 : vector<1x32x128xf32> to vector<32x128xf32>
    %cst_72 = arith.constant dense<0.000000e+00> : vector<8x128xf32>
    %268 = tpu.matmul %247, %267, %cst_72 {dimension_numbers = #tpu.dot_dimension_numbers<[1], [0], [0], [1], [0, 0, 1, 1], [], []>} : vector<8x32xf32>, vector<32x128xf32>, vector<8x128xf32> -> vector<8x128xf32>
    %269 = arith.addf %265, %268 : vector<8x128xf32>
    %cst_73 = arith.constant 0.000000e+00 : f32
    %270 = vector.broadcast %cst_73 : f32 to vector<8x128xf32>
    %271 = arith.maximumf %269, %270 : vector<8x128xf32>
    %c0_74 = arith.constant 0 : index
    %c0_75 = arith.constant 0 : index
    %272 = vector.load %arg13[%c0_74, %c0_75] : memref<128x1xf32, #tpu.memory_space<vmem>>, vector<128x1xf32>
    %cst_76 = arith.constant dense<0.000000e+00> : vector<8x1xf32>
    %273 = tpu.matmul %271, %272, %cst_76 {dimension_numbers = #tpu.dot_dimension_numbers<[1], [0], [0], [1], [0, 0, 1, 1], [], []>} : vector<8x128xf32>, vector<128x1xf32>, vector<8x1xf32> -> vector<8x1xf32>
    %c0_77 = arith.constant 0 : index
    %c0_78 = arith.constant 0 : index
    %274 = vector.load %arg14[%c0_77, %c0_78] : memref<1x1xf32, #tpu.memory_space<vmem>>, vector<1x1xf32>
    %275 = vector.broadcast %274 : vector<1x1xf32> to vector<8x1xf32>
    %276 = arith.addf %273, %275 : vector<8x1xf32>
    %c0_79 = arith.constant 0 : index
    %c0_80 = arith.constant 0 : index
    %277 = vector.load %arg15[%c0_79, %c0_80] : memref<8x1xf32, #tpu.memory_space<vmem>>, vector<8x1xf32>
    tpu.vector_store %arg15[%c0_79, %c0_80], %276 {strides = array<i32>} : memref<8x1xf32, #tpu.memory_space<vmem>>, vector<8x1xf32>,
    return
  }
  func.func @transform_0(%arg0: i32) -> (i32, i32) {
    %c0_i32 = arith.constant 0 : i32
    %c0_i32_0 = arith.constant 0 : i32
    return %arg0, %c0_i32 : i32, i32
  }
  func.func @transform_1(%arg0: i32) -> (i32, i32) {
    %c0_i32 = arith.constant 0 : i32
    %c0_i32_0 = arith.constant 0 : i32
    %c0_i32_1 = arith.constant 0 : i32
    return %c0_i32, %c0_i32_0 : i32, i32
  }
  func.func @transform_2(%arg0: i32) -> (i32, i32) {
    %c0_i32 = arith.constant 0 : i32
    %c0_i32_0 = arith.constant 0 : i32
    %c0_i32_1 = arith.constant 0 : i32
    return %c0_i32, %c0_i32_0 : i32, i32
  }
  func.func @transform_3(%arg0: i32) -> (i32, i32) {
    %c0_i32 = arith.constant 0 : i32
    %c0_i32_0 = arith.constant 0 : i32
    %c0_i32_1 = arith.constant 0 : i32
    return %c0_i32, %c0_i32_0 : i32, i32
  }
  func.func @transform_4(%arg0: i32) -> (i32, i32, i32) {
    %c0_i32 = arith.constant 0 : i32
    %c0_i32_0 = arith.constant 0 : i32
    %c0_i32_1 = arith.constant 0 : i32
    %c0_i32_2 = arith.constant 0 : i32
    return %c0_i32, %c0_i32_0, %c0_i32_1 : i32, i32, i32
  }
  func.func @transform_5(%arg0: i32) -> (i32, i32) {
    %c0_i32 = arith.constant 0 : i32
    %c0_i32_0 = arith.constant 0 : i32
    %c0_i32_1 = arith.constant 0 : i32
    return %c0_i32, %c0_i32_0 : i32, i32
  }
  func.func @transform_6(%arg0: i32) -> (i32, i32) {
    %c0_i32 = arith.constant 0 : i32
    %c0_i32_0 = arith.constant 0 : i32
    %c0_i32_1 = arith.constant 0 : i32
    return %c0_i32, %c0_i32_0 : i32, i32
  }
  func.func @transform_7(%arg0: i32) -> (i32, i32, i32) {
    %c0_i32 = arith.constant 0 : i32
    %c0_i32_0 = arith.constant 0 : i32
    %c0_i32_1 = arith.constant 0 : i32
    %c0_i32_2 = arith.constant 0 : i32
    return %c0_i32, %c0_i32_0, %c0_i32_1 : i32, i32, i32
  }
  func.func @transform_8(%arg0: i32) -> (i32, i32) {
    %c0_i32 = arith.constant 0 : i32
    %c0_i32_0 = arith.constant 0 : i32
    %c0_i32_1 = arith.constant 0 : i32
    return %c0_i32, %c0_i32_0 : i32, i32
  }
  func.func @transform_9(%arg0: i32) -> (i32, i32) {
    %c0_i32 = arith.constant 0 : i32
    %c0_i32_0 = arith.constant 0 : i32
    %c0_i32_1 = arith.constant 0 : i32
    return %c0_i32, %c0_i32_0 : i32, i32
  }
  func.func @transform_10(%arg0: i32) -> (i32, i32, i32) {
    %c0_i32 = arith.constant 0 : i32
    %c0_i32_0 = arith.constant 0 : i32
    %c0_i32_1 = arith.constant 0 : i32
    %c0_i32_2 = arith.constant 0 : i32
    return %c0_i32, %c0_i32_0, %c0_i32_1 : i32, i32, i32
  }
  func.func @transform_11(%arg0: i32) -> (i32, i32) {
    %c0_i32 = arith.constant 0 : i32
    %c0_i32_0 = arith.constant 0 : i32
    %c0_i32_1 = arith.constant 0 : i32
    return %c0_i32, %c0_i32_0 : i32, i32
  }
  func.func @transform_12(%arg0: i32) -> (i32, i32) {
    %c0_i32 = arith.constant 0 : i32
    %c0_i32_0 = arith.constant 0 : i32
    %c0_i32_1 = arith.constant 0 : i32
    return %c0_i32, %c0_i32_0 : i32, i32
  }
  func.func @transform_13(%arg0: i32) -> (i32, i32) {
    %c0_i32 = arith.constant 0 : i32
    %c0_i32_0 = arith.constant 0 : i32
    %c0_i32_1 = arith.constant 0 : i32
    return %c0_i32, %c0_i32_0 : i32, i32
  }
  func.func @transform_14(%arg0: i32) -> (i32, i32) {
    %c0_i32 = arith.constant 0 : i32
    %c0_i32_0 = arith.constant 0 : i32
    return %arg0, %c0_i32 : i32, i32
  }
}

</mosaic_0001>

<bundles_post_ra>
// kernel: tpu_custom_call.1
= control target key start
LH: loop header
LB: loop body
LE: loop exit
PB: predicated region body
PF: predicated region fallthrough
CT: control target
= control target key end

     0   :  { %v2867_v0 = vmov 2   ;;  %v2868_v1 = vmov 0   ;;  %v2869_v3 = vmov 3   ;;  %v2870_v4 = vmov 1   ;;  %s3643_s0 = inlined_call_operand.vmem [shape: f32[8,5], index: 0, kind: input, shape index: {}]   ;;  %s3644_s4 = inlined_call_operand.vmem [shape: f32[2,16,64], index: 4, kind: input, shape index: {}]   ;;  %s3645_s1 = inlined_call_operand.vmem [shape: f32[4,16], index: 1, kind: input, shape index: {}]   ;;  %s3646_s2 = inlined_call_operand.vmem [shape: f32[1,16], index: 2, kind: input, shape index: {}]   ;;  %s3647_s3 = inlined_call_operand.vmem [shape: f32[1,16], index: 3, kind: input, shape index: {}]   ;;  %s3648_s7 = inlined_call_operand.vmem [shape: f32[3,64,32], index: 7, kind: input, shape index: {}]   ;;  %s3649_s5 = inlined_call_operand.vmem [shape: f32[1,64], index: 5, kind: input, shape index: {}]   ;;  %s3650_s6 = inlined_call_operand.vmem [shape: f32[1,64], index: 6, kind: input, shape index: {}]   ;;  %s3651_s10 = inlined_call_operand.vmem [shape: f32[5,32,128], index: 10, kind: input, shape index: {}]   ;;  %s3652_s8 = inlined_call_operand.vmem [shape: f32[1,32], index: 8, kind: input, shape index: {}]   ;;  %s3653_s9 = inlined_call_operand.vmem [shape: f32[1,32], index: 9, kind: input, shape index: {}]   ;;  %s3654_s12 = inlined_call_operand.vmem [shape: f32[128,1], index: 12, kind: input, shape index: {}]   ;;  %s3655_s13 = inlined_call_operand.<no memory space> [shape: f32[1,1], index: 13, kind: input, shape index: {}]   ;;  %s3656_s11 = inlined_call_operand.vmem [shape: f32[1,128], index: 11, kind: input, shape index: {}]   ;;  %s3657_s14 = inlined_call_operand.vmem [shape: f32[8,1], index: 14, kind: output, shape index: {}]  }
   0x1   :  { %2863 = vset.pattern.permute.xlu1 %v2867_v0  ;;  %2861 = vset.pattern.permute.xlu0 %v2868_v1  ;;  %v49_v2 = vld [vmem:[%s3643_s0] sm:$0xff]  ;;  %v2871_v5 = vmov 4   ;;  %v2872_v6 = vmov 0.0   ;;  %v2956_v7 = vld [vmem:[%s3644_s4 + $0x18] sm:$0xff]  ;;  %v2961_v8 = vld [vmem:[%s3644_s4 + $0x8] sm:$0xff]  ;;  %vm2873_vm0 = vmmov 0   ;;  %v58_v11 = vlaneseq }
   0x2   :  { %74 = vperm.xlu1 %2863, %v49_v2   ;;  %55 = vperm.xlu0 %2861, %v49_v2   ;;  %v2969_v9 = vld [vmem:[%s3644_s4 + $0x10] sm:$0xff]  ;;  %v2974_v10 = vld [vmem:[%s3644_s4] sm:$0xff]  ;;  %vm144_vm1 = vcmask 130048   ;;  %v3033_v1 = vld [vmem:[%s3648_s7 + $0xb8] sm:$0xff]  ;;  %vm770_vm2 = vcmask 523264   ;;  %vm1731_vm3 = vcmask 261120  }
   0x3   :  { %2461 = vmatprep.subr.mxu1 %v2872_v6  ;;  %2475 = vmatprep.subr.mxu0 %v2872_v6  ;;  %v59_v12 = vshrl.u32 %v58_v11, 7  ;;  %v50_v16 = vld [vmem:[%s3645_s1] sm:$0xf]  ;;  %vm2222_vm4 = vcmask 7168  }
   0x4   :  { %2462 = vmatpush3.msra.mxu1 %v2956_v7  ;;  %2476 = vmatpush3.msra.mxu0 %v2961_v8  ;;  %v2228_v39 = vld [vmem:[%s3646_s2] ss:$0 sm:$0xff] }
   0x5   :  { %2463 = vmatprep.subr.mxu1 %v2872_v6  ;;  %2477 = vmatprep.subr.mxu0 %v2872_v6  ;;  %v60_v13 = vsub.s32 1, %v59_v12  ;;  %v100_v14 = vsub.s32 0, %v59_v12  ;;  %v69_v15 = vsub.s32 2, %v59_v12  ;;  %v79_v17 = vsub.s32 3, %v59_v12  ;;  %v2229_v43 = vld [vmem:[%s3647_s3] ss:$0 sm:$0xff] }
   0x6   :  { %2864 = vset.pattern.permute.xlu1 %v2869_v3  ;;  %2862 = vset.pattern.permute.xlu0 %v2870_v4  ;;  %v3050_v3 = vld [vmem:[%s3648_s7 + $0xb0] sm:$0xff]  ;;  %v3107_v11 = vld [vmem:[%s3648_s7 + $0xa0] sm:$0xff]  ;;  %v3112_v12 = vld [vmem:[%s3648_s7 + $0x8] sm:$0xff] }
   0x7   :  { %108 = vperm.xlu1 %2864, %v49_v2   ;;  %64 = vperm.xlu0 %2862, %v49_v2   ;;  %v61_v20 = vrot.slane %v50_v16, %v60_v13  ;;  %v101_v21 = vrot.slane %v50_v16, %v100_v14  ;;  %v70_v22 = vrot.slane %v50_v16, %v69_v15  ;;  %v3059_v4 = vld [vmem:[%s3648_s7 + $0x30] sm:$0xff]  ;;  %v3123_v13 = vld [vmem:[%s3648_s7 + $0x98] sm:$0xff]  ;;  %v3128_v14 = vld [vmem:[%s3648_s7] sm:$0xff] }
   0x8   :  { %2464 = vmatpush3.msra.mxu1 %v2969_v9  ;;  %2465 = vmatprep.mubr.msk.f32.mxu1 %vm2873_vm0, %v2872_v6  ;;  %v80_v23 = vrot.slane %v50_v16, %v79_v17  ;;  %v3137_v15 = vld [vmem:[%s3648_s7 + $0x90] sm:$0xff]  ;;  %v3144_v16 = vld [vmem:[%s3648_s7 + $0x88] sm:$0xff]  ;;  %v3151_v17 = vld [vmem:[%s3648_s7 + $0x80] sm:$0xff] }
   0x9   :  { %2468 = vmatprep.subr.mxu1 %v2872_v6  ;;  %2478 = vmatpush3.msra.mxu0 %v2974_v10 }
   0xa   :  { %2479 = vmatprep.mubr.msk.f32.mxu0 %vm2873_vm0, %v2872_v6  ;;  %2489 = vmatprep.subr.mxu0 %v2872_v6 }
   0xb   :  { %2865 = vset.pattern.permute.xlu1 %v2871_v5  ;;  %2866 = vset.pattern.permute.xlu0 %v2871_v5  ;;  %v3067_v5 = vld [vmem:[%s3648_s7 + $0x28] sm:$0xff] }
   0xc   :  { %122 = vperm.xlu1 %2865, %v49_v2   ;;  %v3044_v2 = vld [vmem:[%s3648_s7 + $0x38] sm:$0xff] }
  0x7d   :  { %v56_v18 = vpop.permute.xlu0 %55  ;;  %v75_v19 = vpop.permute.xlu1 %74 }
  0x7e   :  { %v117_v24 = vmul.f32 %v75_v19, %v61_v20  ;;  %v62_v25 = vmul.f32 %v61_v20, %v56_v18  ;;  %v102_v26 = vmul.f32 %v101_v21, %v56_v18  ;;  %v105_v27 = vmul.f32 %v75_v19, %v70_v22  ;;  %v3158_v18 = vld [vmem:[%s3649_s5] ss:$0 sm:$0xff] }
  0x7f   :  { %v81_v33 = vmul.f32 %v80_v23, %v75_v19  ;;  %v130_v48 = vmul.f32 %v101_v21, %v75_v19  ;;  %v3163_v19 = vld [vmem:[%s3650_s6] ss:$0 sm:$0xff] }
  0x82   :  { %v65_v28 = vpop.permute.xlu0 %64  ;;  %v109_v29 = vpop.permute.xlu1 %108 }
  0x83   :  { %v71_v30 = vmul.f32 %v70_v22, %v65_v28  ;;  %v103_v31 = vmul.f32 %v65_v28, %v61_v20  ;;  %v116_v32 = vmul.f32 %v101_v21, %v65_v28  ;;  %v119_v34 = vmul.f32 %v109_v29, %v70_v22  ;;  %v3173_v28 = vld [vmem:[%s3648_s7 + $0x78] sm:$0xff] }
  0x84   :  { %v111_v38 = vmul.f32 %v109_v29, %v80_v23  ;;  %v131_v49 = vmul.f32 %v109_v29, %v61_v20 }
  0x85   :  { %v72_v35 = vadd.f32 %v71_v30, %v62_v25  ;;  %v104_v36 = vadd.f32 %v103_v31, %v102_v26  ;;  %v118_v37 = vadd.f32 %v117_v24, %v116_v32  ;;  %v3181_v32 = vld [vmem:[%s3648_s7 + $0x70] sm:$0xff] }
  0x86   :  { %v132_v56 = vadd.f32 %v131_v49, %v130_v48 }
  0x87   :  { %v106_v40 = vadd.f32 %v105_v27, %v104_v36  ;;  %v123_v41 = vpop.permute.xlu1 %122  ;;  %v82_v42 = vadd.f32 %v81_v33, %v72_v35  ;;  %v120_v44 = vadd.f32 %v119_v34, %v118_v37  ;;  %v3191_v35 = vld [vmem:[%s3648_s7 + $0x68] sm:$0xff] }
  0x88   :  { %v125_v45 = vmul.f32 %v123_v41, %v80_v23  ;;  %v133_v53 = vmul.f32 %v123_v41, %v70_v22 }
  0x89   :  { %v112_v46 = vadd.f32 %v111_v38, %v106_v40  ;;  %v89_v47 = vmul.f32 %v2228_v39, %v82_v42  ;;  %v3199_v38 = vld [vmem:[%s3648_s7 + $0x60] sm:$0xff] }
  0x8a   :  { %v126_v52 = vadd.f32 %v125_v45, %v120_v44  ;;  %v134_v58 = vadd.f32 %v133_v53, %v132_v56 }
  0x8b   :  { %v113_v50 = vmul.f32 %v2228_v39, %v112_v46  ;;  %v96_v51 = vadd.f32 %v2229_v43, %v89_v47  ;;  %v3219_v47 = vld [vmem:[%s3648_s7 + $0x50] sm:$0xff] }
  0x8c   :  { %v127_v57 = vmul.f32 %v2228_v39, %v126_v52  ;;  %v135_v61 = vmul.f32 %v2228_v39, %v134_v58  ;;  %v3238_v52 = vld [vmem:[%s3648_s7 + $0x40] sm:$0xff] }
  0x8d   :  { %v97_v54 = vmax.f32 %v96_v51, 0.0  ;;  %v114_v55 = vadd.f32 %v2229_v43, %v113_v50  ;;  %v3229_v50 = vld [vmem:[%s3648_s7 + $0x48] sm:$0xff] }
  0x8e   :  { %v128_v60 = vadd.f32 %v2229_v43, %v127_v57  ;;  %v136_v63 = vadd.f32 %v2229_v43, %v135_v61  ;;  %v3208_v43 = vld [vmem:[%s3648_s7 + $0x58] sm:$0xff] }
  0x8f   :  { %2466 = vmatmul.mubr.msk.f32.vlgmr.msra.gmra.mxu1 %vm144_vm1, %v97_v54  ;;  %2480 = vmatmul.mubr.msk.f32.vlgmr.msra.gmra.mxu0 %vm144_vm1, %v97_v54  ;;  %v115_v59 = vmax.f32 %v114_v55, 0.0 }
  0x90   :  { %2469 = vmatpush3.msra.mxu1 %v2956_v7  ;;  %2490 = vmatpush3.msra.mxu0 %v2961_v8  ;;  %v129_v62 = vmax.f32 %v128_v60, 0.0  ;;  %v137_v0 = vmax.f32 %v136_v63, 0.0  ;;  %v1729_v63 = vld [vmem:[%s3651_s10 + $0x10] sm:$0xff] }
  0x91   :  { %2470 = vmatprep.subr.mxu1 %v2872_v6  ;;  %2491 = vmatprep.subr.mxu0 %v2872_v6 }
  0x92   :  { %2471 = vmatpush3.msra.mxu1 %v2969_v9  ;;  %2472 = vmatprep.mubr.msk.f32.mxu1 %vm2873_vm0, %v2872_v6 }
  0x93   :  { %2492 = vmatpush3.msra.mxu0 %v2974_v10  ;;  %2493 = vmatprep.mubr.msk.f32.mxu0 %vm2873_vm0, %v2872_v6 }
  0x94   :  { %2473 = vmatmul.mubr.msk.f32.vlgmr.msra.gmra.mxu1 %vm144_vm1, %v115_v59  ;;  %2482 = vmatprep.subr.mxu1 %v2872_v6 }
  0x95   :  { %2494 = vmatmul.mubr.msk.f32.vlgmr.msra.gmra.mxu0 %vm144_vm1, %v115_v59  ;;  %2503 = vmatprep.subr.mxu0 %v2872_v6 }
  0x96   :  { %2483 = vmatpush3.msra.mxu1 %v2956_v7  ;;  %2504 = vmatpush3.msra.mxu0 %v2961_v8 }
  0x97   :  { %2484 = vmatprep.subr.mxu1 %v2872_v6  ;;  %2505 = vmatprep.subr.mxu0 %v2872_v6 }
  0x98   :  { %2485 = vmatpush3.msra.mxu1 %v2969_v9  ;;  %2486 = vmatprep.mubr.msk.f32.mxu1 %vm2873_vm0, %v2872_v6 }
  0x99   :  { %2506 = vmatpush3.msra.mxu0 %v2974_v10  ;;  %2507 = vmatprep.mubr.msk.f32.mxu0 %vm2873_vm0, %v2872_v6 }
  0x9a   :  { %2487 = vmatmul.mubr.msk.f32.vlgmr.msra.gmra.mxu1 %vm144_vm1, %v129_v62  ;;  %2496 = vmatprep.subr.mxu1 %v2872_v6 }
  0x9b   :  { %2508 = vmatmul.mubr.msk.f32.vlgmr.msra.gmra.mxu0 %vm144_vm1, %v129_v62  ;;  %2497 = vmatpush3.msra.mxu1 %v2956_v7  ;;  %v3077_v7 = vld [vmem:[%s3648_s7 + $0x20] sm:$0xff]  ;;  %v1730_v62 = vld [vmem:[%s3651_s10 + $0x18] sm:$0xff] }
  0x9c   :  { %2498 = vmatprep.subr.mxu1 %v2872_v6  ;;  %2500 = vmatprep.mubr.msk.f32.mxu1 %vm2873_vm0, %v2872_v6 }
  0x9d   :  { %2499 = vmatpush3.msra.mxu1 %v2969_v9  ;;  %2517 = vmatprep.subr.mxu0 %v2872_v6  ;;  %v3095_v9 = vld [vmem:[%s3648_s7 + $0xa8] sm:$0xff] }
  0x9e   :  { %2501 = vmatmul.mubr.msk.f32.vlgmr.msra.gmra.mxu1 %vm144_vm1, %v137_v0  ;;  %2510 = vmatprep.subr.mxu1 %v2872_v6 }
  0x9f   :  { %2511 = vmatpush3.msra.mxu1 %v2961_v8  ;;  %2514 = vmatprep.mubr.msk.f32.mxu1 %vm2873_vm0, %v2872_v6  ;;  %v3086_v8 = vld [vmem:[%s3648_s7 + $0x18] sm:$0xff] }
  0xa0   :  { %2512 = vmatprep.subr.mxu1 %v2872_v6  ;;  %2518 = vmatpush3.msra.mxu0 %v3033_v1 }
  0xa1   :  { %2513 = vmatpush3.msra.mxu1 %v2974_v10  ;;  %2519 = vmatprep.subr.mxu0 %v2872_v6  ;;  %v3100_v10 = vld [vmem:[%s3648_s7 + $0x10] sm:$0xff] }
  0xa2   :  { %2515 = vmatmul.mubr.msk.f32.vlgmr.msra.gmra.mxu1 %vm144_vm1, %v137_v0  ;;  %2574 = vmatprep.subr.mxu1 %v2872_v6  ;;  %v1728_v0 = vld [vmem:[%s3651_s10 + $0x8] sm:$0xff] }
  0xa3   :  { %2575 = vmatpush3.msra.mxu1 %v3044_v2  ;;  %2520 = vmatpush3.msra.mxu0 %v3050_v3 }
  0xa4   :  { %2576 = vmatprep.subr.mxu1 %v2872_v6  ;;  %2521 = vmatprep.subr.mxu0 %v2872_v6 }
  0xa5   :  { %2577 = vmatpush3.msra.mxu1 %v3059_v4  ;;  %2590 = vmatprep.mubr.msk.f32.mxu1 %vm2873_vm0, %v2872_v6 }
  0xa6   :  { %2578 = vmatprep.subr.mxu1 %v2872_v6  ;;  %2533 = vmatprep.mubr.msk.f32.mxu0 %vm2873_vm0, %v2872_v6 }
  0xa7   :  { %2579 = vmatpush3.msra.mxu1 %v3067_v5  ;;  %2522 = vmatpush3.msra.mxu0 %v3095_v9 }
  0xa8   :  { %2580 = vmatprep.subr.mxu1 %v2872_v6  ;;  %2523 = vmatprep.subr.mxu0 %v2872_v6 }
  0xa9   :  { %2581 = vmatpush3.msra.mxu1 %v3077_v7  ;;  %2524 = vmatpush3.msra.mxu0 %v3107_v11 }
  0xaa   :  { %2582 = vmatprep.subr.mxu1 %v2872_v6  ;;  %2525 = vmatprep.subr.mxu0 %v2872_v6 }
  0xab   :  { %2583 = vmatpush3.msra.mxu1 %v3086_v8  ;;  %2526 = vmatpush3.msra.mxu0 %v3123_v13 }
  0xac   :  { %2584 = vmatprep.subr.mxu1 %v2872_v6  ;;  %2527 = vmatprep.subr.mxu0 %v2872_v6 }
  0xad   :  { %2585 = vmatpush3.msra.mxu1 %v3100_v10  ;;  %2528 = vmatpush3.msra.mxu0 %v3137_v15 }
  0xae   :  { %2586 = vmatprep.subr.mxu1 %v2872_v6  ;;  %2529 = vmatprep.subr.mxu0 %v2872_v6 }
  0xaf   :  { %2587 = vmatpush3.msra.mxu1 %v3112_v12  ;;  %2530 = vmatpush3.msra.mxu0 %v3144_v16 }
  0xb0   :  { %2588 = vmatprep.subr.mxu1 %v2872_v6  ;;  %2531 = vmatprep.subr.mxu0 %v2872_v6 }
  0xb1   :  { %2589 = vmatpush3.msra.mxu1 %v3128_v14  ;;  %2532 = vmatpush3.msra.mxu0 %v3151_v17 }
  0xb2   :  { %2612 = vmatprep.subr.mxu1 %v2872_v6  ;;  %2536 = vmatprep.subr.mxu0 %v2872_v6 }
 0x14f   :  { %v214_v20 = vpop.f32.mrf.mxu1  ;;  %v372_v21 = vpop.f32.mrf.mxu0 }
 0x150   :  { %v224_v22 = vmul.f32 %v3158_v18, %v214_v20 }
 0x151   :  { %v2467_v23 = vpop.f32.mrf.mxu1  ;;  %v2481_v24 = vpop.f32.mrf.mxu0 }
 0x152   :  { %v3167_v25 = vadd.f32 %v3163_v19, %v224_v22  ;;  %v2259_v22 = vld [vmem:[%s3651_s10 + $0x30] sm:$0xff]  ;;  %v2258_v23 = vld [vmem:[%s3651_s10 + $0x28] sm:$0xff] }
 0x154   :  { %v232_v26 = vmax.f32 %v3167_v25, 0.0  ;;  %v302_v27 = vpop.f32.mrf.mxu1  ;;  %v2257_v25 = vld [vmem:[%s3651_s10 + $0x20] sm:$0xff] }
 0x155   :  { %v373_v29 = vadd.f32 %v372_v21, %v302_v27  ;;  %v518_v30 = vpop.f32.mrf.mxu0  ;;  %v2260_v21 = vld [vmem:[%s3651_s10 + $0x38] sm:$0xff] }
 0x156   :  { %v2474_v31 = vpop.f32.mrf.mxu1  ;;  %2591 = vmatmul.mubr.msk.f32.vlgmr.msra.gmra.mxu1 %vm770_vm2, %v232_v26 }
 0x157   :  { %v376_v33 = vmul.f32 %v3158_v18, %v373_v29  ;;  %v2495_v34 = vpop.f32.mrf.mxu0  ;;  %2613 = vmatpush3.msra.mxu1 %v3173_v28  ;;  %2628 = vmatprep.mubr.msk.f32.mxu1 %vm2873_vm0, %v2872_v6 }
 0x158   :  { %2614 = vmatprep.subr.mxu1 %v2872_v6 }
 0x159   :  { %v377_v36 = vadd.f32 %v3163_v19, %v376_v33  ;;  %2615 = vmatpush3.msra.mxu1 %v3181_v32 }
 0x15a   :  { %v448_v37 = vpop.f32.mrf.mxu1  ;;  %2616 = vmatprep.subr.mxu1 %v2872_v6 }
 0x15b   :  { %v3201_v39 = vmax.f32 %v377_v36, 0.0  ;;  %v519_v40 = vadd.f32 %v518_v30, %v448_v37  ;;  %v664_v41 = vpop.f32.mrf.mxu0  ;;  %2617 = vmatpush3.msra.mxu1 %v3191_v35 }
 0x15c   :  { %v2488_v42 = vpop.f32.mrf.mxu1  ;;  %2618 = vmatprep.subr.mxu1 %v2872_v6 }
 0x15d   :  { %v522_v44 = vmul.f32 %v3158_v18, %v519_v40  ;;  %v2509_v45 = vpop.f32.mrf.mxu0  ;;  %2534 = vmatmul.mubr.msk.f32.vlgmr.msra.gmra.mxu0 %vm770_vm2, %v3201_v39  ;;  %2619 = vmatpush3.msra.mxu1 %v3199_v38  ;;  %v2268_v40 = vld [vmem:[%s3651_s10 + $0x68] sm:$0xff]  ;;  %v2267_v42 = vld [vmem:[%s3651_s10 + $0x60] sm:$0xff] }
 0x15e   :  { %v594_v46 = vpop.f32.mrf.mxu1  ;;  %2537 = vmatpush3.msra.mxu0 %v3173_v28  ;;  %2620 = vmatprep.subr.mxu1 %v2872_v6 }
 0x15f   :  { %2538 = vmatprep.subr.mxu0 %v2872_v6  ;;  %2621 = vmatpush3.msra.mxu1 %v3208_v43  ;;  %v523_v48 = vadd.f32 %v3163_v19, %v522_v44  ;;  %v665_v57 = vadd.f32 %v664_v41, %v594_v46 }
 0x160   :  { %v2502_v49 = vpop.f32.mrf.mxu1  ;;  %2539 = vmatpush3.msra.mxu0 %v3181_v32  ;;  %2622 = vmatprep.subr.mxu1 %v2872_v6 }
 0x161   :  { %2540 = vmatprep.subr.mxu0 %v2872_v6  ;;  %2623 = vmatpush3.msra.mxu1 %v3219_v47  ;;  %v3243_v54 = vmax.f32 %v523_v48, 0.0  ;;  %v668_v58 = vmul.f32 %v3158_v18, %v665_v57 }
 0x162   :  { %v737_v51 = vpop.f32.mrf.mxu1  ;;  %2541 = vmatpush3.msra.mxu0 %v3191_v35  ;;  %2624 = vmatprep.subr.mxu1 %v2872_v6 }
 0x163   :  { %v741_v53 = vmul.f32 %v3158_v18, %v737_v51  ;;  %2542 = vmatprep.subr.mxu0 %v2872_v6  ;;  %2625 = vmatpush3.msra.mxu1 %v3229_v50  ;;  %v669_v59 = vadd.f32 %v3163_v19, %v668_v58  ;;  %v2275_v51 = vld [vmem:[%s3651_s10 + $0x98] sm:$0xff] }
 0x164   :  { %v2516_v55 = vpop.f32.mrf.mxu1  ;;  %2543 = vmatpush3.msra.mxu0 %v3199_v38  ;;  %2626 = vmatprep.subr.mxu1 %v2872_v6 }
 0x165   :  { %v3248_v56 = vadd.f32 %v3163_v19, %v741_v53  ;;  %2544 = vmatprep.subr.mxu0 %v2872_v6  ;;  %2627 = vmatpush3.msra.mxu1 %v3238_v52  ;;  %v3292_v60 = vmax.f32 %v669_v59, 0.0  ;;  %v2273_v53 = vld [vmem:[%s3651_s10 + $0x88] sm:$0xff] }
 0x166   :  { %2545 = vmatpush3.msra.mxu0 %v3208_v43  ;;  %2629 = vmatmul.mubr.msk.f32.vlgmr.msra.gmra.mxu1 %vm770_vm2, %v3243_v54 }
 0x167   :  { %2546 = vmatprep.subr.mxu0 %v2872_v6  ;;  %2650 = vmatprep.subr.mxu1 %v2872_v6  ;;  %v743_v61 = vmax.f32 %v3248_v56, 0.0 }
 0x168   :  { %2547 = vmatpush3.msra.mxu0 %v3219_v47  ;;  %2651 = vmatpush3.msra.mxu1 %v3033_v1 }
 0x169   :  { %2548 = vmatprep.subr.mxu0 %v2872_v6  ;;  %2652 = vmatprep.subr.mxu1 %v2872_v6 }
 0x16a   :  { %2549 = vmatpush3.msra.mxu0 %v3229_v50  ;;  %2653 = vmatpush3.msra.mxu1 %v3050_v3 }
 0x16b   :  { %2550 = vmatprep.subr.mxu0 %v2872_v6  ;;  %2654 = vmatprep.subr.mxu1 %v2872_v6 }
 0x16c   :  { %2551 = vmatpush3.msra.mxu0 %v3238_v52  ;;  %2552 = vmatprep.mubr.msk.f32.mxu0 %vm2873_vm0, %v2872_v6 }
 0x16d   :  { %2655 = vmatpush3.msra.mxu1 %v3095_v9  ;;  %2553 = vmatmul.mubr.msk.f32.vlgmr.msra.gmra.mxu0 %vm770_vm2, %v232_v26 }
 0x16e   :  { %2555 = vmatprep.subr.mxu0 %v2872_v6  ;;  %2656 = vmatprep.subr.mxu1 %v2872_v6 }
 0x16f   :  { %2556 = vmatpush3.msra.mxu0 %v3173_v28  ;;  %2657 = vmatpush3.msra.mxu1 %v3107_v11 }
 0x170   :  { %2557 = vmatprep.subr.mxu0 %v2872_v6  ;;  %2658 = vmatprep.subr.mxu1 %v2872_v6 }
 0x171   :  { %2558 = vmatpush3.msra.mxu0 %v3181_v32  ;;  %2659 = vmatpush3.msra.mxu1 %v3123_v13 }
 0x172   :  { %2559 = vmatprep.subr.mxu0 %v2872_v6  ;;  %2660 = vmatprep.subr.mxu1 %v2872_v6 }
 0x173   :  { %2560 = vmatpush3.msra.mxu0 %v3191_v35  ;;  %2661 = vmatpush3.msra.mxu1 %v3137_v15 }
 0x174   :  { %2561 = vmatprep.subr.mxu0 %v2872_v6  ;;  %2662 = vmatprep.subr.mxu1 %v2872_v6 }
 0x175   :  { %2562 = vmatpush3.msra.mxu0 %v3199_v38  ;;  %2663 = vmatpush3.msra.mxu1 %v3144_v16 }
 0x176   :  { %2563 = vmatprep.subr.mxu0 %v2872_v6  ;;  %2664 = vmatprep.subr.mxu1 %v2872_v6 }
 0x177   :  { %2564 = vmatpush3.msra.mxu0 %v3208_v43  ;;  %2665 = vmatpush3.msra.mxu1 %v3151_v17 }
 0x178   :  { %2666 = vmatprep.mubr.msk.f32.mxu1 %vm2873_vm0, %v2872_v6  ;;  %2565 = vmatprep.subr.mxu0 %v2872_v6 }
 0x179   :  { %2667 = vmatmul.mubr.msk.f32.vlgmr.msra.gmra.mxu1 %vm770_vm2, %v3292_v60  ;;  %2688 = vmatprep.subr.mxu1 %v2872_v6 }
 0x17a   :  { %2566 = vmatpush3.msra.mxu0 %v3219_v47  ;;  %2689 = vmatpush3.msra.mxu1 %v3044_v2 }
 0x17b   :  { %2567 = vmatprep.subr.mxu0 %v2872_v6  ;;  %2690 = vmatprep.subr.mxu1 %v2872_v6 }
 0x17c   :  { %2568 = vmatpush3.msra.mxu0 %v3229_v50  ;;  %2691 = vmatpush3.msra.mxu1 %v3059_v4 }
 0x17d   :  { %2569 = vmatprep.subr.mxu0 %v2872_v6  ;;  %2692 = vmatprep.subr.mxu1 %v2872_v6 }
 0x17e   :  { %2570 = vmatpush3.msra.mxu0 %v3238_v52  ;;  %2571 = vmatprep.mubr.msk.f32.mxu0 %vm2873_vm0, %v2872_v6 }
 0x17f   :  { %2693 = vmatpush3.msra.mxu1 %v3067_v5  ;;  %2572 = vmatmul.mubr.msk.f32.vlgmr.msra.gmra.mxu0 %vm770_vm2, %v3201_v39 }
 0x180   :  { %2593 = vmatprep.subr.mxu0 %v2872_v6  ;;  %2694 = vmatprep.subr.mxu1 %v2872_v6 }
 0x181   :  { %2594 = vmatpush3.msra.mxu0 %v3033_v1  ;;  %2695 = vmatpush3.msra.mxu1 %v3077_v7 }
 0x182   :  { %2595 = vmatprep.subr.mxu0 %v2872_v6  ;;  %2696 = vmatprep.subr.mxu1 %v2872_v6 }
 0x183   :  { %2596 = vmatpush3.msra.mxu0 %v3050_v3  ;;  %2697 = vmatpush3.msra.mxu1 %v3086_v8 }
 0x184   :  { %2597 = vmatprep.subr.mxu0 %v2872_v6  ;;  %2698 = vmatprep.subr.mxu1 %v2872_v6 }
 0x185   :  { %2598 = vmatpush3.msra.mxu0 %v3095_v9  ;;  %2699 = vmatpush3.msra.mxu1 %v3100_v10 }
 0x186   :  { %2599 = vmatprep.subr.mxu0 %v2872_v6  ;;  %2700 = vmatprep.subr.mxu1 %v2872_v6 }
 0x187   :  { %2600 = vmatpush3.msra.mxu0 %v3107_v11  ;;  %2701 = vmatpush3.msra.mxu1 %v3112_v12 }
 0x188   :  { %2601 = vmatprep.subr.mxu0 %v2872_v6  ;;  %2702 = vmatprep.subr.mxu1 %v2872_v6 }
 0x189   :  { %2602 = vmatpush3.msra.mxu0 %v3123_v13  ;;  %2703 = vmatpush3.msra.mxu1 %v3128_v14 }
 0x18a   :  { %2704 = vmatprep.mubr.msk.f32.mxu1 %vm2873_vm0, %v2872_v6  ;;  %2603 = vmatprep.subr.mxu0 %v2872_v6 }
 0x18b   :  { %2705 = vmatmul.mubr.msk.f32.vlgmr.msra.gmra.mxu1 %vm770_vm2, %v3243_v54  ;;  %2726 = vmatprep.subr.mxu1 %v2872_v6 }
 0x18c   :  { %2604 = vmatpush3.msra.mxu0 %v3137_v15  ;;  %2727 = vmatpush3.msra.mxu1 %v3173_v28 }
 0x18d   :  { %2605 = vmatprep.subr.mxu0 %v2872_v6  ;;  %2728 = vmatprep.subr.mxu1 %v2872_v6 }
 0x18e   :  { %2606 = vmatpush3.msra.mxu0 %v3144_v16  ;;  %2729 = vmatpush3.msra.mxu1 %v3181_v32 }
 0x18f   :  { %2607 = vmatprep.subr.mxu0 %v2872_v6  ;;  %2730 = vmatprep.subr.mxu1 %v2872_v6 }
 0x190   :  { %2608 = vmatpush3.msra.mxu0 %v3151_v17  ;;  %2609 = vmatprep.mubr.msk.f32.mxu0 %vm2873_vm0, %v2872_v6 }
 0x191   :  { %2731 = vmatpush3.msra.mxu1 %v3191_v35  ;;  %2610 = vmatmul.mubr.msk.f32.vlgmr.msra.gmra.mxu0 %vm770_vm2, %v3243_v54  ;;  %v2272_v54 = vld [vmem:[%s3651_s10 + $0x80] sm:$0xff] }
 0x192   :  { %2631 = vmatprep.subr.mxu0 %v2872_v6  ;;  %2732 = vmatprep.subr.mxu1 %v2872_v6 }
 0x193   :  { %2632 = vmatpush3.msra.mxu0 %v3044_v2  ;;  %2733 = vmatpush3.msra.mxu1 %v3199_v38 }
 0x194   :  { %2633 = vmatprep.subr.mxu0 %v2872_v6  ;;  %2734 = vmatprep.subr.mxu1 %v2872_v6 }
 0x195   :  { %2634 = vmatpush3.msra.mxu0 %v3059_v4  ;;  %2735 = vmatpush3.msra.mxu1 %v3208_v43 }
 0x196   :  { %2635 = vmatprep.subr.mxu0 %v2872_v6  ;;  %2736 = vmatprep.subr.mxu1 %v2872_v6 }
 0x197   :  { %2636 = vmatpush3.msra.mxu0 %v3067_v5  ;;  %2737 = vmatpush3.msra.mxu1 %v3219_v47 }
 0x198   :  { %2637 = vmatprep.subr.mxu0 %v2872_v6  ;;  %2738 = vmatprep.subr.mxu1 %v2872_v6 }
 0x199   :  { %2638 = vmatpush3.msra.mxu0 %v3077_v7  ;;  %2739 = vmatpush3.msra.mxu1 %v3229_v50 }
 0x19a   :  { %2639 = vmatprep.subr.mxu0 %v2872_v6  ;;  %2740 = vmatprep.subr.mxu1 %v2872_v6 }
 0x19b   :  { %2640 = vmatpush3.msra.mxu0 %v3086_v8  ;;  %2741 = vmatpush3.msra.mxu1 %v3238_v52 }
 0x19c   :  { %2742 = vmatprep.mubr.msk.f32.mxu1 %vm2873_vm0, %v2872_v6  ;;  %2641 = vmatprep.subr.mxu0 %v2872_v6 }
 0x19d   :  { %2743 = vmatmul.mubr.msk.f32.vlgmr.msra.gmra.mxu1 %vm770_vm2, %v743_v61  ;;  %2642 = vmatpush3.msra.mxu0 %v3100_v10 }
 0x19e   :  { %2643 = vmatprep.subr.mxu0 %v2872_v6  ;;  %2647 = vmatprep.mubr.msk.f32.mxu0 %vm2873_vm0, %v2872_v6 }
 0x19f   :  { %2644 = vmatpush3.msra.mxu0 %v3112_v12  ;;  %2764 = vmatprep.subr.mxu1 %v2872_v6 }
 0x1a0   :  { %2645 = vmatprep.subr.mxu0 %v2872_v6  ;;  %2772 = vmatprep.mubr.msk.f32.mxu1 %vm2873_vm0, %v2872_v6 }
 0x1a1   :  { %2646 = vmatpush3.msra.mxu0 %v3128_v14  ;;  %2765 = vmatpush3.msra.mxu1 %v1730_v62 }
 0x1a2   :  { %2648 = vmatmul.mubr.msk.f32.vlgmr.msra.gmra.mxu0 %vm770_vm2, %v3201_v39  ;;  %2669 = vmatprep.subr.mxu0 %v2872_v6  ;;  %v2269_v39 = vld [vmem:[%s3651_s10 + $0x70] sm:$0xff] }
 0x1a3   :  { %2670 = vmatpush3.msra.mxu0 %v3173_v28  ;;  %2685 = vmatprep.mubr.msk.f32.mxu0 %vm2873_vm0, %v2872_v6 }
 0x1a4   :  { %2671 = vmatprep.subr.mxu0 %v2872_v6  ;;  %2766 = vmatprep.subr.mxu1 %v2872_v6 }
 0x1a5   :  { %2672 = vmatpush3.msra.mxu0 %v3181_v32  ;;  %2767 = vmatpush3.msra.mxu1 %v1729_v63 }
 0x1a6   :  { %2673 = vmatprep.subr.mxu0 %v2872_v6  ;;  %2768 = vmatprep.subr.mxu1 %v2872_v6 }
 0x1a7   :  { %2674 = vmatpush3.msra.mxu0 %v3191_v35  ;;  %2769 = vmatpush3.msra.mxu1 %v1728_v0 }
 0x1a8   :  { %2675 = vmatprep.subr.mxu0 %v2872_v6  ;;  %2770 = vmatprep.subr.mxu1 %v2872_v6 }
 0x1a9   :  { %2676 = vmatpush3.msra.mxu0 %v3199_v38  ;;  %v2270_v38 = vld [vmem:[%s3651_s10 + $0x78] sm:$0xff] }
 0x1aa   :  { %2677 = vmatprep.subr.mxu0 %v2872_v6 }
 0x1ab   :  { %2678 = vmatpush3.msra.mxu0 %v3208_v43 }
 0x1ac   :  { %2679 = vmatprep.subr.mxu0 %v2872_v6 }
 0x1ad   :  { %2680 = vmatpush3.msra.mxu0 %v3219_v47 }
 0x1ae   :  { %2681 = vmatprep.subr.mxu0 %v2872_v6 }
 0x1af   :  { %2682 = vmatpush3.msra.mxu0 %v3229_v50 }
 0x1b0   :  { %2683 = vmatprep.subr.mxu0 %v2872_v6 }
 0x1b1   :  { %2684 = vmatpush3.msra.mxu0 %v3238_v52  ;;  %v2274_v52 = vld [vmem:[%s3651_s10 + $0x90] sm:$0xff] }
 0x1b2   :  { %2686 = vmatmul.mubr.msk.f32.vlgmr.msra.gmra.mxu0 %vm770_vm2, %v3292_v60  ;;  %2707 = vmatprep.subr.mxu0 %v2872_v6 }
 0x1b3   :  { %2708 = vmatpush3.msra.mxu0 %v3033_v1  ;;  %2723 = vmatprep.mubr.msk.f32.mxu0 %vm2873_vm0, %v2872_v6  ;;  %v1727_v1 = vld [vmem:[%s3651_s10] sm:$0xff] }
 0x1b4   :  { %2709 = vmatprep.subr.mxu0 %v2872_v6  ;;  %2771 = vmatpush3.msra.mxu1 %v1727_v1 }
 0x1b5   :  { %2710 = vmatpush3.msra.mxu0 %v3050_v3  ;;  %2775 = vmatprep.subr.mxu1 %v2872_v6  ;;  %v2264_v3 = vld [vmem:[%s3651_s10 + $0x50] sm:$0xff] }
 0x1b6   :  { %2711 = vmatprep.subr.mxu0 %v2872_v6 }
 0x1b7   :  { %2712 = vmatpush3.msra.mxu0 %v3095_v9 }
 0x1b8   :  { %2713 = vmatprep.subr.mxu0 %v2872_v6 }
 0x1b9   :  { %2714 = vmatpush3.msra.mxu0 %v3107_v11 }
 0x1ba   :  { %2715 = vmatprep.subr.mxu0 %v2872_v6 }
 0x1bb   :  { %2716 = vmatpush3.msra.mxu0 %v3123_v13  ;;  %v3494_v13 = vld [vmem:[%s3652_s8] ss:$0 sm:$0xff] }
 0x1bc   :  { %2717 = vmatprep.subr.mxu0 %v2872_v6 }
 0x1bd   :  { %2718 = vmatpush3.msra.mxu0 %v3137_v15 }
 0x1be   :  { %2719 = vmatprep.subr.mxu0 %v2872_v6 }
 0x1bf   :  { %2720 = vmatpush3.msra.mxu0 %v3144_v16  ;;  %v3499_v16 = vld [vmem:[%s3653_s9] ss:$0 sm:$0xff] }
 0x1c0   :  { %2721 = vmatprep.subr.mxu0 %v2872_v6 }
 0x1c1   :  { %2722 = vmatpush3.msra.mxu0 %v3151_v17 }
 0x1c2   :  { %2724 = vmatmul.mubr.msk.f32.vlgmr.msra.gmra.mxu0 %vm770_vm2, %v743_v61  ;;  %2745 = vmatprep.subr.mxu0 %v2872_v6 }
 0x1c3   :  { %2746 = vmatpush3.msra.mxu0 %v3044_v2  ;;  %2761 = vmatprep.mubr.msk.f32.mxu0 %vm2873_vm0, %v2872_v6  ;;  %v2265_v2 = vld [vmem:[%s3651_s10 + $0x58] sm:$0xff] }
 0x1c4   :  { %2747 = vmatprep.subr.mxu0 %v2872_v6 }
 0x1c5   :  { %2748 = vmatpush3.msra.mxu0 %v3059_v4  ;;  %v2263_v4 = vld [vmem:[%s3651_s10 + $0x48] sm:$0xff] }
 0x1c6   :  { %2749 = vmatprep.subr.mxu0 %v2872_v6 }
 0x1c7   :  { %2750 = vmatpush3.msra.mxu0 %v3067_v5  ;;  %v2262_v5 = vld [vmem:[%s3651_s10 + $0x40] sm:$0xff] }
 0x1c8   :  { %2751 = vmatprep.subr.mxu0 %v2872_v6 }
 0x1c9   :  { %2752 = vmatpush3.msra.mxu0 %v3077_v7 }
 0x1ca   :  { %2753 = vmatprep.subr.mxu0 %v2872_v6 }
 0x1cb   :  { %2754 = vmatpush3.msra.mxu0 %v3086_v8 }
 0x1cc   :  { %2755 = vmatprep.subr.mxu0 %v2872_v6 }
 0x1cd   :  { %2756 = vmatpush3.msra.mxu0 %v3100_v10 }
 0x1ce   :  { %2757 = vmatprep.subr.mxu0 %v2872_v6 }
 0x1cf   :  { %2758 = vmatpush3.msra.mxu0 %v3112_v12 }
 0x1d0   :  { %2759 = vmatprep.subr.mxu0 %v2872_v6 }
 0x1d1   :  { %2760 = vmatpush3.msra.mxu0 %v3128_v14 }
 0x1d2   :  { %2762 = vmatmul.mubr.msk.f32.vlgmr.msra.gmra.mxu0 %vm770_vm2, %v3292_v60  ;;  %2786 = vmatprep.subr.mxu0 %v2872_v6 }
 0x1d3   :  { %2794 = vmatprep.mubr.msk.f32.mxu0 %vm2873_vm0, %v2872_v6  ;;  %2787 = vmatpush3.msra.mxu0 %v2265_v2 }
 0x1d4   :  { %2788 = vmatprep.subr.mxu0 %v2872_v6 }
 0x1d5   :  { %2789 = vmatpush3.msra.mxu0 %v2264_v3 }
 0x1d6   :  { %2790 = vmatprep.subr.mxu0 %v2872_v6 }
 0x1d7   :  { %2791 = vmatpush3.msra.mxu0 %v2263_v4 }
 0x1d8   :  { %2792 = vmatprep.subr.mxu0 %v2872_v6 }
 0x1d9   :  { %2793 = vmatpush3.msra.mxu0 %v2262_v5 }
 0x1da   :  { %2808 = vmatprep.subr.mxu0 %v2872_v6 }
 0x216   :  { %v1068_v7 = vpop.f32.mrf.mxu1 }
 0x218   :  { %v2592_v8 = vpop.f32.mrf.mxu1 }
 0x219   :  { %v2143_v8 = vld [vmem:[%s3654_s12 + $0x70] sm:$0xff] }
 0x21d   :  { %v840_v9 = vpop.f32.mrf.mxu0 }
 0x21f   :  { %v2535_v10 = vpop.f32.mrf.mxu0 }
 0x220   :  { %v2141_v10 = vld [vmem:[%s3654_s12 + $0x60] sm:$0xff] }
 0x226   :  { %v1215_v11 = vpop.f32.mrf.mxu1 }
 0x228   :  { %v2630_v12 = vpop.f32.mrf.mxu1 }
 0x229   :  { %v2139_v12 = vld [vmem:[%s3654_s12 + $0x50] sm:$0xff] }
 0x22d   :  { %v913_v14 = vpop.f32.mrf.mxu0 }
 0x22e   :  { %v914_v15 = vadd.f32 %v913_v14, %v840_v9  ;;  %v2142_v9 = vld [vmem:[%s3654_s12 + $0x68] sm:$0xff]  ;;  %v2137_v14 = vld [vmem:[%s3654_s12 + $0x40] sm:$0xff] }
 0x22f   :  { %v2554_v17 = vpop.f32.mrf.mxu0 }
 0x230   :  { %v923_v18 = vmul.f32 %v3494_v13, %v914_v15  ;;  %v2136_v15 = vld [vmem:[%s3654_s12 + $0x38] sm:$0xff]  ;;  %v2134_v17 = vld [vmem:[%s3654_s12 + $0x28] sm:$0xff] }
 0x232   :  { %v930_v19 = vadd.f32 %v3499_v16, %v923_v18  ;;  %v2133_v18 = vld [vmem:[%s3654_s12 + $0x20] sm:$0xff] }
 0x234   :  { %v931_v20 = vmax.f32 %v930_v19, 0.0  ;;  %v2132_v19 = vld [vmem:[%s3654_s12 + $0x18] sm:$0xff] }
 0x236   :  { %2773 = vmatmul.mubr.msk.f32.vlgmr.msra.gmra.mxu1 %vm1731_vm3, %v931_v20  ;;  %v2131_v20 = vld [vmem:[%s3654_s12 + $0x10] sm:$0xff] }
 0x237   :  { %2776 = vmatpush3.msra.mxu1 %v2260_v21  ;;  %2783 = vmatprep.mubr.msk.f32.mxu1 %vm2873_vm0, %v2872_v6  ;;  %v2130_v21 = vld [vmem:[%s3654_s12 + $0x8] sm:$0xff] }
 0x238   :  { %2777 = vmatprep.subr.mxu1 %v2872_v6 }
 0x239   :  { %v1358_v24 = vpop.f32.mrf.mxu1  ;;  %2778 = vmatpush3.msra.mxu1 %v2259_v22  ;;  %v2129_v22 = vld [vmem:[%s3654_s12] sm:$0xff] }
 0x23a   :  { %2779 = vmatprep.subr.mxu1 %v2872_v6 }
 0x23b   :  { %v2668_v26 = vpop.f32.mrf.mxu1  ;;  %2780 = vmatpush3.msra.mxu1 %v2258_v23  ;;  %v19_v23 = vstv %s3655_s13 }
 0x23c   :  { %2781 = vmatprep.subr.mxu1 %v2872_v6  ;;  %20 = vst [vmem:[#allocation2] sm:$0x1] %v19_v23 }
 0x23d   :  { %2782 = vmatpush3.msra.mxu1 %v2257_v25 }
 0x23e   :  { %2797 = vmatprep.subr.mxu1 %v2872_v6 }
 0x23f   :  { %v998_v27 = vpop.f32.mrf.mxu0 }
 0x240   :  { %v1069_v31 = vadd.f32 %v1068_v7, %v998_v27  ;;  %v2144_v7 = vld [vmem:[%s3654_s12 + $0x78] sm:$0xff] }
 0x241   :  { %v2573_v28 = vpop.f32.mrf.mxu0 }
 0x24b   :  { %v1502_v29 = vpop.f32.mrf.mxu1 }
 0x24d   :  { %v2706_v30 = vpop.f32.mrf.mxu1 }
 0x251   :  { %v1141_v32 = vpop.f32.mrf.mxu0 }
 0x252   :  { %v1145_v33 = vadd.f32 %v1141_v32, %v1069_v31  ;;  %v2256_v32 = vld [vmem:[%s3656_s11] ss:$0 sm:$0xff] }
 0x253   :  { %v2611_v34 = vpop.f32.mrf.mxu0 }
 0x254   :  { %v1146_v35 = vmul.f32 %v3494_v13, %v1145_v33 }
 0x256   :  { %v1147_v36 = vadd.f32 %v3499_v16, %v1146_v35 }
 0x258   :  { %v1148_v37 = vmax.f32 %v1147_v36, 0.0 }
 0x25a   :  { %2784 = vmatmul.mubr.msk.f32.vlgmr.msra.gmra.mxu1 %vm1731_vm3, %v1148_v37 }
 0x25b   :  { %2798 = vmatpush3.msra.mxu1 %v2270_v38  ;;  %2805 = vmatprep.mubr.msk.f32.mxu1 %vm2873_vm0, %v2872_v6 }
 0x25c   :  { %2799 = vmatprep.subr.mxu1 %v2872_v6 }
 0x25d   :  { %v1649_v41 = vpop.f32.mrf.mxu1  ;;  %2800 = vmatpush3.msra.mxu1 %v2269_v39 }
 0x25e   :  { %2801 = vmatprep.subr.mxu1 %v2872_v6 }
 0x25f   :  { %v2744_v43 = vpop.f32.mrf.mxu1  ;;  %2802 = vmatpush3.msra.mxu1 %v2268_v40  ;;  %v2277_v40 = vld [vmem:[#allocation2] ss:$0 sm:$0xff] }
 0x260   :  { %2803 = vmatprep.subr.mxu1 %v2872_v6 }
 0x261   :  { %2804 = vmatpush3.msra.mxu1 %v2267_v42 }
 0x262   :  { %v1285_v44 = vpop.f32.mrf.mxu0  ;;  %2819 = vmatprep.subr.mxu1 %v2872_v6 }
 0x263   :  { %v1286_v45 = vadd.f32 %v1285_v44, %v1215_v11  ;;  %v2140_v11 = vld [vmem:[%s3654_s12 + $0x58] sm:$0xff] }
 0x264   :  { %v2649_v46 = vpop.f32.mrf.mxu0 }
 0x265   :  { %v1362_v47 = vadd.f32 %v1358_v24, %v1286_v45 }
 0x267   :  { %v1363_v48 = vmul.f32 %v3494_v13, %v1362_v47 }
 0x269   :  { %v1364_v49 = vadd.f32 %v3499_v16, %v1363_v48 }
 0x26b   :  { %v1365_v50 = vmax.f32 %v1364_v49, 0.0 }
 0x26d   :  { %2795 = vmatmul.mubr.msk.f32.vlgmr.msra.gmra.mxu0 %vm1731_vm3, %v1365_v50 }
 0x26e   :  { %2809 = vmatpush3.msra.mxu0 %v2275_v51  ;;  %2816 = vmatprep.mubr.msk.f32.mxu0 %vm2873_vm0, %v2872_v6 }
 0x26f   :  { %2810 = vmatprep.subr.mxu0 %v2872_v6 }
 0x270   :  { %2811 = vmatpush3.msra.mxu0 %v2274_v52 }
 0x271   :  { %2812 = vmatprep.subr.mxu0 %v2872_v6 }
 0x272   :  { %v1432_v55 = vpop.f32.mrf.mxu0  ;;  %2813 = vmatpush3.msra.mxu0 %v2273_v53 }
 0x273   :  { %2814 = vmatprep.subr.mxu0 %v2872_v6  ;;  %v1503_v57 = vadd.f32 %v1502_v29, %v1432_v55 }
 0x274   :  { %v2687_v56 = vpop.f32.mrf.mxu0  ;;  %2815 = vmatpush3.msra.mxu0 %v2272_v54 }
 0x282   :  { %v1575_v58 = vpop.f32.mrf.mxu0 }
 0x283   :  { %v1579_v59 = vadd.f32 %v1575_v58, %v1503_v57 }
 0x284   :  { %v2725_v60 = vpop.f32.mrf.mxu0 }
 0x285   :  { %v1580_v61 = vmul.f32 %v3494_v13, %v1579_v59 }
 0x287   :  { %v1581_v62 = vadd.f32 %v3499_v16, %v1580_v61 }
 0x289   :  { %v1582_v63 = vmax.f32 %v1581_v62, 0.0 }
 0x28b   :  { %2806 = vmatmul.mubr.msk.f32.vlgmr.msra.gmra.mxu1 %vm1731_vm3, %v1582_v63 }
 0x28c   :  { %2851 = vmatprep.mubr.msk.f32.mxu1 %vm2873_vm0, %v2872_v6  ;;  %2820 = vmatpush3.msra.mxu1 %v2144_v7 }
 0x28d   :  { %2821 = vmatprep.subr.mxu1 %v2872_v6 }
 0x28e   :  { %2822 = vmatpush3.msra.mxu1 %v2143_v8 }
 0x28f   :  { %2823 = vmatprep.subr.mxu1 %v2872_v6 }
 0x290   :  { %2824 = vmatpush3.msra.mxu1 %v2142_v9 }
 0x291   :  { %2825 = vmatprep.subr.mxu1 %v2872_v6 }
 0x292   :  { %v1719_v0 = vpop.f32.mrf.mxu0  ;;  %2826 = vmatpush3.msra.mxu1 %v2141_v10 }
 0x293   :  { %v1720_v1 = vadd.f32 %v1719_v0, %v1649_v41  ;;  %2827 = vmatprep.subr.mxu1 %v2872_v6 }
 0x294   :  { %v2763_v2 = vpop.f32.mrf.mxu0  ;;  %2828 = vmatpush3.msra.mxu1 %v2140_v11 }
 0x295   :  { %v1723_v3 = vmul.f32 %v3494_v13, %v1720_v1  ;;  %2829 = vmatprep.subr.mxu1 %v2872_v6  ;;  %v2138_v13 = vld [vmem:[%s3654_s12 + $0x48] sm:$0xff] }
 0x296   :  { %2830 = vmatpush3.msra.mxu1 %v2139_v12 }
 0x297   :  { %v1724_v4 = vadd.f32 %v3499_v16, %v1723_v3  ;;  %2831 = vmatprep.subr.mxu1 %v2872_v6  ;;  %v2135_v16 = vld [vmem:[%s3654_s12 + $0x30] sm:$0xff] }
 0x298   :  { %2832 = vmatpush3.msra.mxu1 %v2138_v13 }
 0x299   :  { %v1725_v5 = vmax.f32 %v1724_v4, 0.0  ;;  %2833 = vmatprep.subr.mxu1 %v2872_v6 }
 0x29a   :  { %2834 = vmatpush3.msra.mxu1 %v2137_v14 }
 0x29b   :  { %2817 = vmatmul.mubr.msk.f32.vlgmr.msra.gmra.mxu0 %vm1731_vm3, %v1725_v5  ;;  %2835 = vmatprep.subr.mxu1 %v2872_v6 }
 0x29c   :  { %2836 = vmatpush3.msra.mxu1 %v2136_v15 }
 0x29d   :  { %2837 = vmatprep.subr.mxu1 %v2872_v6 }
 0x29e   :  { %2838 = vmatpush3.msra.mxu1 %v2135_v16 }
 0x29f   :  { %2839 = vmatprep.subr.mxu1 %v2872_v6 }
 0x2a0   :  { %2840 = vmatpush3.msra.mxu1 %v2134_v17 }
 0x2a1   :  { %2841 = vmatprep.subr.mxu1 %v2872_v6 }
 0x2a2   :  { %2842 = vmatpush3.msra.mxu1 %v2133_v18 }
 0x2a3   :  { %2843 = vmatprep.subr.mxu1 %v2872_v6 }
 0x2a4   :  { %2844 = vmatpush3.msra.mxu1 %v2132_v19 }
 0x2a5   :  { %2845 = vmatprep.subr.mxu1 %v2872_v6 }
 0x2a6   :  { %2846 = vmatpush3.msra.mxu1 %v2131_v20 }
 0x2a7   :  { %2847 = vmatprep.subr.mxu1 %v2872_v6 }
 0x2a8   :  { %2848 = vmatpush3.msra.mxu1 %v2130_v21 }
 0x2a9   :  { %2849 = vmatprep.subr.mxu1 %v2872_v6 }
 0x2aa   :  { %2850 = vmatpush3.msra.mxu1 %v2129_v22 }
 0x2f6   :  { %v1801_v24 = vpop.f32.mrf.mxu1 }
 0x2f7   :  { %v1811_v33 = vadd.f32 %v2256_v32, %v1801_v24 }
 0x2f8   :  { %v2774_v25 = vpop.f32.mrf.mxu1 }
 0x31a   :  { %v1886_v26 = vpop.f32.mrf.mxu1 }
 0x31b   :  { %v1890_v6 = vadd.f32 %v1886_v26, %v1811_v33 }
 0x31c   :  { %v2785_v27 = vpop.f32.mrf.mxu1 }
 0x32d   :  { %v1965_v28 = vpop.f32.mrf.mxu0 }
 0x32e   :  { %v1969_v34 = vadd.f32 %v1965_v28, %v1890_v6 }
 0x32f   :  { %v2796_v29 = vpop.f32.mrf.mxu0 }
 0x34b   :  { %v2044_v30 = vpop.f32.mrf.mxu1 }
 0x34c   :  { %v2048_v35 = vadd.f32 %v2044_v30, %v1969_v34 }
 0x34d   :  { %v2807_v31 = vpop.f32.mrf.mxu1 }
 0x35b   :  { %v2123_v36 = vpop.f32.mrf.mxu0 }
 0x35c   :  { %v2127_v37 = vadd.f32 %v2123_v36, %v2048_v35 }
 0x35d   :  { %v2818_v38 = vpop.f32.mrf.mxu0 }
 0x35e   :  { %v2128_v39 = vmax.f32 %v2127_v37, 0.0 }
 0x360   :  { %2852 = vmatmul.mubr.f32.vlgmr.msra.gmra.mxu1 %v2128_v39 }
 0x420   :  { %v2218_v41 = vpop.f32.mrf.mxu1 }
 0x421   :  { %v2219_v42 = vadd.f32 %v2277_v40, %v2218_v41 }
 0x422   :  { %v2853_v43 = vpop.f32.mrf.mxu1 }
 0x423   :  { %2223 = vst.msk [vmem:[%s3657_s14] sm:$0xff] %vm2222_vm4, %v2219_v42 }

</bundles_post_ra>
